<compile_context>
chip_gen: v6e
topology: v6e:2x2x1
jax: 0.10.0
libtpu: 0.0.40
codegen_flags: <defaults>
</compile_context>

<pallas_src>
import jax
import jax.numpy as jnp
from jax import lax
from jax.experimental import pallas as pl
from jax.experimental.pallas import tpu as pltpu


# ----------------------------- Pallas kernels ------------------------------

def _conv_pool_kernel(p_ref, w_ref, b_ref, o_ref):
    """Fused conv(as matmul) + bias + ReLU + 2x2 max-pool, lane-dense output.

    p_ref: (4, K, MT)  im2col patches; axis 0 = 2x2 pooling-window member,
                       K = padded contraction dim, MT = batch*pooled-spatial tile.
    w_ref: (Cout, K)   pre-reshaped conv weights (zero-padded K / Cout).
    b_ref: (Cout, 1)
    o_ref: (Cout, MT)  pooled, ReLU'd conv output (channels on sublanes,
                       batch*spatial dense on lanes -> unmasked stores).
    """
    w = w_ref[...]
    m = jnp.dot(w, p_ref[0], preferred_element_type=jnp.float32)
    for j in range(1, 4):
        m = jnp.maximum(m, jnp.dot(w, p_ref[j], preferred_element_type=jnp.float32))
    # relu(max_j z_j + b) == max-pool of relu(z_j + b)  (same bias, monotone relu)
    o_ref[...] = jnp.maximum(m + b_ref[...], 0.0)


def _fc_kernel(x_ref, w1_ref, b1_ref, w2_ref, b2_ref, w3_ref, b3_ref, o_ref):
    """Whole fc1->fc2->fc3 chain, batched over images, single grid step.

    x_ref : (N, 400)   flattened conv2 features (PyTorch (c, ph, pw) order).
    w1_ref: (400, 120) b1_ref: (1, 120)
    w2_ref: (120, 84)  b2_ref: (1, 84)
    w3_ref: (84, 10)   b3_ref: (1, 10)
    o_ref : (N, 10)
    """
    h = jnp.dot(x_ref[...], w1_ref[...], preferred_element_type=jnp.float32) + b1_ref[...]
    h = jnp.maximum(h, 0.0)
    h = jnp.dot(h, w2_ref[...], preferred_element_type=jnp.float32) + b2_ref[...]
    h = jnp.maximum(h, 0.0)
    o_ref[...] = jnp.dot(h, w3_ref[...], preferred_element_type=jnp.float32) + b3_ref[...]


# ------------------------------ wrappers ------------------------------------

_MAX_TILE = 2048  # lane tile cap (block is ~1-5 MiB -> safe on v5e/v6e/v7x VMEM)


def _round_up(x, m):
    return (x + m - 1) // m * m


def _lane_tiling(m):
    """Return (padded_m, tile). Single step for small m, 2048-lane 'parallel'
    tiles (>=2 steps, so both v7x TCs get work) for large m."""
    mp = _round_up(m, 128)
    if mp <= _MAX_TILE:
        return mp, mp
    mp = _round_up(m, _MAX_TILE)
    return mp, _MAX_TILE


def _pooled_conv_patches_cm(xc, k, pool_out):
    """Channel-major im2col for a VALID kxk conv followed by 2x2/2 max-pool.

    xc: (C, N, H, W)  ->  (4, C*k*k, N*pool_out^2)
    Row order is (c, kh, kw); column order is (n, ph, pw); leading axis is the
    pooling-window member a*2+b.  Only (k+1)^2 strided slices are taken (each
    shared by every (a,kh)/(b,kw) pair with the same offset sum).
    """
    C, N, _, _ = xc.shape
    P = pool_out
    base = {}
    for r in range(k + 1):
        for s in range(k + 1):
            sl = xc[:, :, r:r + 2 * P - 1:2, s:s + 2 * P - 1:2]   # (C, N, P, P)
            base[(r, s)] = sl.reshape(C, N * P * P)
    members = []
    for a in range(2):
        for b in range(2):
            rows = jnp.stack([base[(a + kh, b + kw)]
                              for kh in range(k) for kw in range(k)], axis=1)
            members.append(rows.reshape(C * k * k, N * P * P))
    return jnp.stack(members, axis=0)


def _conv_pool_call(p, w, b, cout, tile):
    """p: (4, K, Mp), w: (cout, K), b: (cout, 1) -> (cout, Mp)."""
    _, K, Mp = p.shape
    return pl.pallas_call(
        _conv_pool_kernel,
        out_shape=jax.ShapeDtypeStruct((cout, Mp), jnp.float32),
        grid=(Mp // tile,),
        in_specs=[
            pl.BlockSpec((4, K, tile), lambda i: (0, 0, i)),
            pl.BlockSpec((cout, K), lambda i: (0, 0)),
            pl.BlockSpec((cout, 1), lambda i: (0, 0)),
        ],
        out_specs=pl.BlockSpec((cout, tile), lambda i: (0, i)),
        compiler_params=pltpu.CompilerParams(dimension_semantics=("parallel",)),
    )(p, w, b)


def prepare_params(params):
    """One-time re-layout of the PyTorch-style parameters for the kernels."""
    w1 = params["conv1_w"].reshape(6, 25).astype(jnp.float32)
    w1 = jnp.pad(w1, ((0, 2), (0, 7)))                      # Cout 6->8, K 25->32
    b1 = jnp.pad(params["conv1_b"].astype(jnp.float32), (0, 2)).reshape(8, 1)
    w2 = params["conv2_w"].reshape(16, 150).astype(jnp.float32)
    w2 = jnp.pad(w2, ((0, 0), (0, 10)))                     # K 150->160
    return {
        "w1": w1, "b1": b1,
        "w2": w2, "b2": params["conv2_b"].reshape(16, 1).astype(jnp.float32),
        # fc1 weight as (400, 120); row order (c, ph, pw) matches both the
        # PyTorch flatten and the kernel's lane-dense (16, N*25) layout.
        "w1fc": params["fc1_w"].T.astype(jnp.float32),
        "b1fc": params["fc1_b"].reshape(1, 120).astype(jnp.float32),
        "w2fc": params["fc2_w"].T.astype(jnp.float32),
        "b2fc": params["fc2_b"].reshape(1, 84).astype(jnp.float32),
        "w3fc": params["fc3_w"].T.astype(jnp.float32),
        "b3fc": params["fc3_b"].reshape(1, 10).astype(jnp.float32),
    }


def net_forward(x_nchw, prep):
    """x_nchw: (N, 1, 32, 32) float32 -> (N, 10) float32."""
    N = x_nchw.shape[0]
    x = x_nchw.astype(jnp.float32)

    # ---- stage 1: conv1 + ReLU + 2x2 pool, batch*spatial dense on lanes ----
    xc = jnp.transpose(x, (1, 0, 2, 3))                     # (1, N, 32, 32)
    p1 = _pooled_conv_patches_cm(xc, 5, 14)                 # (4, 25, N*196)
    m1 = N * 14 * 14
    m1p, t1 = _lane_tiling(m1)
    p1 = jnp.pad(p1, ((0, 0), (0, 7), (0, m1p - m1)))       # (4, 32, m1p)
    y1 = _conv_pool_call(p1, prep["w1"], prep["b1"], 8, t1)  # (8, m1p)

    # ---- stage 2: conv2 + ReLU + pool, lane-dense (16, N*25) ----
    # kernel-1 output is already channel-major (6, N, 14, 14): no transpose.
    y1c = y1[:6, :m1].reshape(6, N, 14, 14)
    p2 = _pooled_conv_patches_cm(y1c, 5, 5)                 # (4, 150, N*25)
    m2 = N * 25
    m2p, t2 = _lane_tiling(m2)
    p2 = jnp.pad(p2, ((0, 0), (0, 10), (0, m2p - m2)))      # (4, 160, m2p)
    y2 = _conv_pool_call(p2, prep["w2"], prep["b2"], 16, t2)  # (16, m2p)

    # tiny XLA relayout to PyTorch flatten order (c, ph, pw) per image
    flat = y2[:, :m2].reshape(16, N, 25).transpose(1, 0, 2).reshape(N, 400)

    # ---- stage 3: fc1 -> fc2 -> fc3, batched over images, one grid step ----
    out = pl.pallas_call(
        _fc_kernel,
        out_shape=jax.ShapeDtypeStruct((N, 10), jnp.float32),
        grid=(1,),
        in_specs=[
            pl.BlockSpec((N, 400), lambda i: (0, 0)),
            pl.BlockSpec((400, 120), lambda i: (0, 0)),
            pl.BlockSpec((1, 120), lambda i: (0, 0)),
            pl.BlockSpec((120, 84), lambda i: (0, 0)),
            pl.BlockSpec((1, 84), lambda i: (0, 0)),
            pl.BlockSpec((84, 10), lambda i: (0, 0)),
            pl.BlockSpec((1, 10), lambda i: (0, 0)),
        ],
        out_specs=pl.BlockSpec((N, 10), lambda i: (0, 0)),
        compiler_params=pltpu.CompilerParams(dimension_semantics=("arbitrary",)),
    )(flat, prep["w1fc"], prep["b1fc"], prep["w2fc"], prep["b2fc"],
      prep["w3fc"], prep["b3fc"])

    return out


# ------------------------------ parameters ----------------------------------

def init_params(key):
    def uniform(key, shape, fan_in):
        bound = 1.0 / jnp.sqrt(jnp.float32(fan_in))
        return jax.random.uniform(key, shape, jnp.float32, -bound, bound)

    ks = jax.random.split(key, 10)
    return {
        # PyTorch conv weight layout: (Cout, Cin, KH, KW)
        "conv1_w": uniform(ks[0], (6, 1, 5, 5), 1 * 5 * 5),
        "conv1_b": uniform(ks[1], (6,), 1 * 5 * 5),
        "conv2_w": uniform(ks[2], (16, 6, 5, 5), 6 * 5 * 5),
        "conv2_b": uniform(ks[3], (16,), 6 * 5 * 5),
        # PyTorch linear weight layout: (out_features, in_features)
        "fc1_w": uniform(ks[4], (120, 16 * 5 * 5), 16 * 5 * 5),
        "fc1_b": uniform(ks[5], (120,), 16 * 5 * 5),
        "fc2_w": uniform(ks[6], (84, 120), 120),
        "fc2_b": uniform(ks[7], (84,), 120),
        "fc3_w": uniform(ks[8], (10, 84), 84),
        "fc3_b": uniform(ks[9], (10,), 84),
    }


# ------------------------------ pure-JAX reference ---------------------------

def net_reference(x_nchw, params):
    def conv(x, w, b):
        y = lax.conv_general_dilated(
            x, w, window_strides=(1, 1), padding="VALID",
            dimension_numbers=("NCHW", "OIHW", "NCHW"))
        return y + b.reshape(1, -1, 1, 1)

    def pool(x):
        return lax.reduce_window(x, -jnp.inf, lax.max,
                                 (1, 1, 2, 2), (1, 1, 2, 2), "VALID")

    y = pool(jnp.maximum(conv(x_nchw, params["conv1_w"], params["conv1_b"]), 0.0))
    y = pool(jnp.maximum(conv(y, params["conv2_w"], params["conv2_b"]), 0.0))
    flat = y.reshape(y.shape[0], -1)
    h = jnp.maximum(flat @ params["fc1_w"].T + params["fc1_b"], 0.0)
    h = jnp.maximum(h @ params["fc2_w"].T + params["fc2_b"], 0.0)
    return h @ params["fc3_w"].T + params["fc3_b"]


# ------------------------------------ main -----------------------------------

if __name__ == "__main__":
    key = jax.random.PRNGKey(0)
    pkey, xkey = jax.random.split(key)
    params = init_params(pkey)
    prep = prepare_params(params)   # one-time weight re-layout (hoisted out of forward)

    # LeNet arithmetic requires 32x32 spatial input (16*5*5 flat features).
    x = jax.random.normal(xkey, (2, 1, 32, 32), dtype=jnp.float32)

    fwd = jax.jit(net_forward)
    out = jax.block_until_ready(fwd(x, prep))
    assert out.shape == (2, 10), out.shape

    ref = jax.block_until_ready(net_reference(x, params))
    assert jnp.allclose(out, ref, rtol=1e-4, atol=1e-4), \
        float(jnp.max(jnp.abs(out - ref)))

    print("KERNEL_OK")
</pallas_src>

<mosaic_0001>
module attributes {stable_mosaic.version = 11 : i64} {
  func.func @_conv_pool_kernel(%arg0: i32, %arg1: memref<4x32x512xf32, #tpu.memory_space<vmem>>, %arg2: memref<8x32xf32, #tpu.memory_space<vmem>>, %arg3: memref<8x1xf32, #tpu.memory_space<vmem>>, %arg4: memref<8x512xf32, #tpu.memory_space<vmem>>) attributes {dimension_semantics = [#tpu.dimension_semantics<parallel>], iteration_bounds = array<i64: 1>, scalar_prefetch = 0 : i64, scratch_operands = 0 : i64, tpu.core_type = #tpu.core_type<tc>, window_params = [{transform_indices = @transform_0, window_bounds = array<i64: 4, 32, 512>}, {pipeline_mode = #tpu.pipeline_mode<synchronous>, transform_indices = @transform_1, window_bounds = array<i64: 8, 32>}, {pipeline_mode = #tpu.pipeline_mode<synchronous>, transform_indices = @transform_2, window_bounds = array<i64: 8, 1>}, {transform_indices = @transform_3, window_bounds = array<i64: 8, 512>}]} {
    %c0 = arith.constant 0 : index
    %c0_0 = arith.constant 0 : index
    %0 = vector.load %arg2[%c0, %c0_0] : memref<8x32xf32, #tpu.memory_space<vmem>>, vector<8x32xf32>
    %c0_1 = arith.constant 0 : index
    %c0_2 = arith.constant 0 : index
    %c0_3 = arith.constant 0 : index
    %1 = vector.load %arg1[%c0_1, %c0_2, %c0_3] : memref<4x32x512xf32, #tpu.memory_space<vmem>>, vector<1x32x512xf32>
    %2 = vector.shape_cast %1 : vector<1x32x512xf32> to vector<32x512xf32>
    %cst = arith.constant dense<0.000000e+00> : vector<8x512xf32>
    %3 = tpu.matmul %0, %2, %cst {dimension_numbers = #tpu.dot_dimension_numbers<[1], [0], [0], [1], [0, 0, 1, 1], [], []>} : vector<8x32xf32>, vector<32x512xf32>, vector<8x512xf32> -> vector<8x512xf32>
    %c1 = arith.constant 1 : index
    %c0_4 = arith.constant 0 : index
    %c0_5 = arith.constant 0 : index
    %4 = vector.load %arg1[%c1, %c0_4, %c0_5] : memref<4x32x512xf32, #tpu.memory_space<vmem>>, vector<1x32x512xf32>
    %5 = vector.shape_cast %4 : vector<1x32x512xf32> to vector<32x512xf32>
    %cst_6 = arith.constant dense<0.000000e+00> : vector<8x512xf32>
    %6 = tpu.matmul %0, %5, %cst_6 {dimension_numbers = #tpu.dot_dimension_numbers<[1], [0], [0], [1], [0, 0, 1, 1], [], []>} : vector<8x32xf32>, vector<32x512xf32>, vector<8x512xf32> -> vector<8x512xf32>
    %7 = arith.maximumf %3, %6 : vector<8x512xf32>
    %c2 = arith.constant 2 : index
    %c0_7 = arith.constant 0 : index
    %c0_8 = arith.constant 0 : index
    %8 = vector.load %arg1[%c2, %c0_7, %c0_8] : memref<4x32x512xf32, #tpu.memory_space<vmem>>, vector<1x32x512xf32>
    %9 = vector.shape_cast %8 : vector<1x32x512xf32> to vector<32x512xf32>
    %cst_9 = arith.constant dense<0.000000e+00> : vector<8x512xf32>
    %10 = tpu.matmul %0, %9, %cst_9 {dimension_numbers = #tpu.dot_dimension_numbers<[1], [0], [0], [1], [0, 0, 1, 1], [], []>} : vector<8x32xf32>, vector<32x512xf32>, vector<8x512xf32> -> vector<8x512xf32>
    %11 = arith.maximumf %7, %10 : vector<8x512xf32>
    %c3 = arith.constant 3 : index
    %c0_10 = arith.constant 0 : index
    %c0_11 = arith.constant 0 : index
    %12 = vector.load %arg1[%c3, %c0_10, %c0_11] : memref<4x32x512xf32, #tpu.memory_space<vmem>>, vector<1x32x512xf32>
    %13 = vector.shape_cast %12 : vector<1x32x512xf32> to vector<32x512xf32>
    %cst_12 = arith.constant dense<0.000000e+00> : vector<8x512xf32>
    %14 = tpu.matmul %0, %13, %cst_12 {dimension_numbers = #tpu.dot_dimension_numbers<[1], [0], [0], [1], [0, 0, 1, 1], [], []>} : vector<8x32xf32>, vector<32x512xf32>, vector<8x512xf32> -> vector<8x512xf32>
    %15 = arith.maximumf %11, %14 : vector<8x512xf32>
    %c0_13 = arith.constant 0 : index
    %c0_14 = arith.constant 0 : index
    %16 = vector.load %arg3[%c0_13, %c0_14] : memref<8x1xf32, #tpu.memory_space<vmem>>, vector<8x1xf32>
    %17 = vector.broadcast %16 : vector<8x1xf32> to vector<8x512xf32>
    %18 = arith.addf %15, %17 : vector<8x512xf32>
    %cst_15 = arith.constant 0.000000e+00 : f32
    %19 = vector.broadcast %cst_15 : f32 to vector<8x512xf32>
    %20 = arith.maximumf %18, %19 : vector<8x512xf32>
    %c0_16 = arith.constant 0 : index
    %c0_17 = arith.constant 0 : index
    %21 = vector.load %arg4[%c0_16, %c0_17] : memref<8x512xf32, #tpu.memory_space<vmem>>, vector<8x512xf32>
    tpu.vector_store %arg4[%c0_16, %c0_17], %20 {strides = array<i32>} : memref<8x512xf32, #tpu.memory_space<vmem>>, vector<8x512xf32>,
    return
  }
  func.func @transform_0(%arg0: i32) -> (i32, i32, i32) {
    %c0_i32 = arith.constant 0 : i32
    %c0_i32_0 = arith.constant 0 : i32
    %c0_i32_1 = arith.constant 0 : i32
    return %c0_i32, %c0_i32_0, %arg0 : i32, i32, i32
  }
  func.func @transform_1(%arg0: i32) -> (i32, i32) {
    %c0_i32 = arith.constant 0 : i32
    %c0_i32_0 = arith.constant 0 : i32
    %c0_i32_1 = arith.constant 0 : i32
    return %c0_i32, %c0_i32_0 : i32, i32
  }
  func.func @transform_2(%arg0: i32) -> (i32, i32) {
    %c0_i32 = arith.constant 0 : i32
    %c0_i32_0 = arith.constant 0 : i32
    %c0_i32_1 = arith.constant 0 : i32
    return %c0_i32, %c0_i32_0 : i32, i32
  }
  func.func @transform_3(%arg0: i32) -> (i32, i32) {
    %c0_i32 = arith.constant 0 : i32
    %c0_i32_0 = arith.constant 0 : i32
    return %c0_i32, %arg0 : i32, i32
  }
}

module attributes {stable_mosaic.version = 11 : i64} {
  func.func @_conv_pool_kernel(%arg0: i32, %arg1: memref<4x160x128xf32, #tpu.memory_space<vmem>>, %arg2: memref<16x160xf32, #tpu.memory_space<vmem>>, %arg3: memref<16x1xf32, #tpu.memory_space<vmem>>, %arg4: memref<16x128xf32, #tpu.memory_space<vmem>>) attributes {dimension_semantics = [#tpu.dimension_semantics<parallel>], iteration_bounds = array<i64: 1>, scalar_prefetch = 0 : i64, scratch_operands = 0 : i64, tpu.core_type = #tpu.core_type<tc>, window_params = [{transform_indices = @transform_0, window_bounds = array<i64: 4, 160, 128>}, {pipeline_mode = #tpu.pipeline_mode<synchronous>, transform_indices = @transform_1, window_bounds = array<i64: 16, 160>}, {pipeline_mode = #tpu.pipeline_mode<synchronous>, transform_indices = @transform_2, window_bounds = array<i64: 16, 1>}, {transform_indices = @transform_3, window_bounds = array<i64: 16, 128>}]} {
    %c0 = arith.constant 0 : index
    %c0_0 = arith.constant 0 : index
    %0 = vector.load %arg2[%c0, %c0_0] : memref<16x160xf32, #tpu.memory_space<vmem>>, vector<16x160xf32>
    %c0_1 = arith.constant 0 : index
    %c0_2 = arith.constant 0 : index
    %c0_3 = arith.constant 0 : index
    %1 = vector.load %arg1[%c0_1, %c0_2, %c0_3] : memref<4x160x128xf32, #tpu.memory_space<vmem>>, vector<1x160x128xf32>
    %2 = vector.shape_cast %1 : vector<1x160x128xf32> to vector<160x128xf32>
    %cst = arith.constant dense<0.000000e+00> : vector<16x128xf32>
    %3 = tpu.matmul %0, %2, %cst {dimension_numbers = #tpu.dot_dimension_numbers<[1], [0], [0], [1], [0, 0, 1, 1], [], []>} : vector<16x160xf32>, vector<160x128xf32>, vector<16x128xf32> -> vector<16x128xf32>
    %c1 = arith.constant 1 : index
    %c0_4 = arith.constant 0 : index
    %c0_5 = arith.constant 0 : index
    %4 = vector.load %arg1[%c1, %c0_4, %c0_5] : memref<4x160x128xf32, #tpu.memory_space<vmem>>, vector<1x160x128xf32>
    %5 = vector.shape_cast %4 : vector<1x160x128xf32> to vector<160x128xf32>
    %cst_6 = arith.constant dense<0.000000e+00> : vector<16x128xf32>
    %6 = tpu.matmul %0, %5, %cst_6 {dimension_numbers = #tpu.dot_dimension_numbers<[1], [0], [0], [1], [0, 0, 1, 1], [], []>} : vector<16x160xf32>, vector<160x128xf32>, vector<16x128xf32> -> vector<16x128xf32>
    %7 = arith.maximumf %3, %6 : vector<16x128xf32>
    %c2 = arith.constant 2 : index
    %c0_7 = arith.constant 0 : index
    %c0_8 = arith.constant 0 : index
    %8 = vector.load %arg1[%c2, %c0_7, %c0_8] : memref<4x160x128xf32, #tpu.memory_space<vmem>>, vector<1x160x128xf32>
    %9 = vector.shape_cast %8 : vector<1x160x128xf32> to vector<160x128xf32>
    %cst_9 = arith.constant dense<0.000000e+00> : vector<16x128xf32>
    %10 = tpu.matmul %0, %9, %cst_9 {dimension_numbers = #tpu.dot_dimension_numbers<[1], [0], [0], [1], [0, 0, 1, 1], [], []>} : vector<16x160xf32>, vector<160x128xf32>, vector<16x128xf32> -> vector<16x128xf32>
    %11 = arith.maximumf %7, %10 : vector<16x128xf32>
    %c3 = arith.constant 3 : index
    %c0_10 = arith.constant 0 : index
    %c0_11 = arith.constant 0 : index
    %12 = vector.load %arg1[%c3, %c0_10, %c0_11] : memref<4x160x128xf32, #tpu.memory_space<vmem>>, vector<1x160x128xf32>
    %13 = vector.shape_cast %12 : vector<1x160x128xf32> to vector<160x128xf32>
    %cst_12 = arith.constant dense<0.000000e+00> : vector<16x128xf32>
    %14 = tpu.matmul %0, %13, %cst_12 {dimension_numbers = #tpu.dot_dimension_numbers<[1], [0], [0], [1], [0, 0, 1, 1], [], []>} : vector<16x160xf32>, vector<160x128xf32>, vector<16x128xf32> -> vector<16x128xf32>
    %15 = arith.maximumf %11, %14 : vector<16x128xf32>
    %c0_13 = arith.constant 0 : index
    %c0_14 = arith.constant 0 : index
    %16 = vector.load %arg3[%c0_13, %c0_14] : memref<16x1xf32, #tpu.memory_space<vmem>>, vector<16x1xf32>
    %17 = vector.broadcast %16 : vector<16x1xf32> to vector<16x128xf32>
    %18 = arith.addf %15, %17 : vector<16x128xf32>
    %cst_15 = arith.constant 0.000000e+00 : f32
    %19 = vector.broadcast %cst_15 : f32 to vector<16x128xf32>
    %20 = arith.maximumf %18, %19 : vector<16x128xf32>
    %c0_16 = arith.constant 0 : index
    %c0_17 = arith.constant 0 : index
    %21 = vector.load %arg4[%c0_16, %c0_17] : memref<16x128xf32, #tpu.memory_space<vmem>>, vector<16x128xf32>
    tpu.vector_store %arg4[%c0_16, %c0_17], %20 {strides = array<i32>} : memref<16x128xf32, #tpu.memory_space<vmem>>, vector<16x128xf32>,
    return
  }
  func.func @transform_0(%arg0: i32) -> (i32, i32, i32) {
    %c0_i32 = arith.constant 0 : i32
    %c0_i32_0 = arith.constant 0 : i32
    %c0_i32_1 = arith.constant 0 : i32
    return %c0_i32, %c0_i32_0, %arg0 : i32, i32, i32
  }
  func.func @transform_1(%arg0: i32) -> (i32, i32) {
    %c0_i32 = arith.constant 0 : i32
    %c0_i32_0 = arith.constant 0 : i32
    %c0_i32_1 = arith.constant 0 : i32
    return %c0_i32, %c0_i32_0 : i32, i32
  }
  func.func @transform_2(%arg0: i32) -> (i32, i32) {
    %c0_i32 = arith.constant 0 : i32
    %c0_i32_0 = arith.constant 0 : i32
    %c0_i32_1 = arith.constant 0 : i32
    return %c0_i32, %c0_i32_0 : i32, i32
  }
  func.func @transform_3(%arg0: i32) -> (i32, i32) {
    %c0_i32 = arith.constant 0 : i32
    %c0_i32_0 = arith.constant 0 : i32
    return %c0_i32, %arg0 : i32, i32
  }
}

module attributes {stable_mosaic.version = 11 : i64} {
  func.func @_fc_kernel(%arg0: i32, %arg1: memref<2x400xf32, #tpu.memory_space<vmem>>, %arg2: memref<400x120xf32, #tpu.memory_space<vmem>>, %arg3: memref<1x120xf32, #tpu.memory_space<vmem>>, %arg4: memref<120x84xf32, #tpu.memory_space<vmem>>, %arg5: memref<1x84xf32, #tpu.memory_space<vmem>>, %arg6: memref<84x10xf32, #tpu.memory_space<vmem>>, %arg7: memref<1x10xf32, #tpu.memory_space<vmem>>, %arg8: memref<2x10xf32, #tpu.memory_space<vmem>>) attributes {dimension_semantics = [#tpu.dimension_semantics<arbitrary>], iteration_bounds = array<i64: 1>, scalar_prefetch = 0 : i64, scratch_operands = 0 : i64, tpu.core_type = #tpu.core_type<tc>, window_params = [{pipeline_mode = #tpu.pipeline_mode<synchronous>, transform_indices = @transform_0, window_bounds = array<i64: 2, 400>}, {pipeline_mode = #tpu.pipeline_mode<synchronous>, transform_indices = @transform_1, window_bounds = array<i64: 400, 120>}, {pipeline_mode = #tpu.pipeline_mode<synchronous>, transform_indices = @transform_2, window_bounds = array<i64: 1, 120>}, {pipeline_mode = #tpu.pipeline_mode<synchronous>, transform_indices = @transform_3, window_bounds = array<i64: 120, 84>}, {pipeline_mode = #tpu.pipeline_mode<synchronous>, transform_indices = @transform_4, window_bounds = array<i64: 1, 84>}, {pipeline_mode = #tpu.pipeline_mode<synchronous>, transform_indices = @transform_5, window_bounds = array<i64: 84, 10>}, {pipeline_mode = #tpu.pipeline_mode<synchronous>, transform_indices = @transform_6, window_bounds = array<i64: 1, 10>}, {pipeline_mode = #tpu.pipeline_mode<synchronous>, transform_indices = @transform_7, window_bounds = array<i64: 2, 10>}]} {
    %c0 = arith.constant 0 : index
    %c0_0 = arith.constant 0 : index
    %0 = vector.load %arg1[%c0, %c0_0] : memref<2x400xf32, #tpu.memory_space<vmem>>, vector<2x400xf32>
    %c0_1 = arith.constant 0 : index
    %c0_2 = arith.constant 0 : index
    %1 = vector.load %arg2[%c0_1, %c0_2] : memref<400x120xf32, #tpu.memory_space<vmem>>, vector<400x120xf32>
    %cst = arith.constant dense<0.000000e+00> : vector<2x120xf32>
    %2 = tpu.matmul %0, %1, %cst {dimension_numbers = #tpu.dot_dimension_numbers<[1], [0], [0], [1], [0, 0, 1, 1], [], []>} : vector<2x400xf32>, vector<400x120xf32>, vector<2x120xf32> -> vector<2x120xf32>
    %c0_3 = arith.constant 0 : index
    %c0_4 = arith.constant 0 : index
    %3 = vector.load %arg3[%c0_3, %c0_4] : memref<1x120xf32, #tpu.memory_space<vmem>>, vector<1x120xf32>
    %4 = vector.broadcast %3 : vector<1x120xf32> to vector<2x120xf32>
    %5 = arith.addf %2, %4 : vector<2x120xf32>
    %cst_5 = arith.constant 0.000000e+00 : f32
    %6 = vector.broadcast %cst_5 : f32 to vector<2x120xf32>
    %7 = arith.maximumf %5, %6 : vector<2x120xf32>
    %c0_6 = arith.constant 0 : index
    %c0_7 = arith.constant 0 : index
    %8 = vector.load %arg4[%c0_6, %c0_7] : memref<120x84xf32, #tpu.memory_space<vmem>>, vector<120x84xf32>
    %cst_8 = arith.constant dense<0.000000e+00> : vector<2x84xf32>
    %9 = tpu.matmul %7, %8, %cst_8 {dimension_numbers = #tpu.dot_dimension_numbers<[1], [0], [0], [1], [0, 0, 1, 1], [], []>} : vector<2x120xf32>, vector<120x84xf32>, vector<2x84xf32> -> vector<2x84xf32>
    %c0_9 = arith.constant 0 : index
    %c0_10 = arith.constant 0 : index
    %10 = vector.load %arg5[%c0_9, %c0_10] : memref<1x84xf32, #tpu.memory_space<vmem>>, vector<1x84xf32>
    %11 = vector.broadcast %10 : vector<1x84xf32> to vector<2x84xf32>
    %12 = arith.addf %9, %11 : vector<2x84xf32>
    %cst_11 = arith.constant 0.000000e+00 : f32
    %13 = vector.broadcast %cst_11 : f32 to vector<2x84xf32>
    %14 = arith.maximumf %12, %13 : vector<2x84xf32>
    %c0_12 = arith.constant 0 : index
    %c0_13 = arith.constant 0 : index
    %15 = vector.load %arg6[%c0_12, %c0_13] : memref<84x10xf32, #tpu.memory_space<vmem>>, vector<84x10xf32>
    %cst_14 = arith.constant dense<0.000000e+00> : vector<2x10xf32>
    %16 = tpu.matmul %14, %15, %cst_14 {dimension_numbers = #tpu.dot_dimension_numbers<[1], [0], [0], [1], [0, 0, 1, 1], [], []>} : vector<2x84xf32>, vector<84x10xf32>, vector<2x10xf32> -> vector<2x10xf32>
    %c0_15 = arith.constant 0 : index
    %c0_16 = arith.constant 0 : index
    %17 = vector.load %arg7[%c0_15, %c0_16] : memref<1x10xf32, #tpu.memory_space<vmem>>, vector<1x10xf32>
    %18 = vector.broadcast %17 : vector<1x10xf32> to vector<2x10xf32>
    %19 = arith.addf %16, %18 : vector<2x10xf32>
    %c0_17 = arith.constant 0 : index
    %c0_18 = arith.constant 0 : index
    %20 = vector.load %arg8[%c0_17, %c0_18] : memref<2x10xf32, #tpu.memory_space<vmem>>, vector<2x10xf32>
    tpu.vector_store %arg8[%c0_17, %c0_18], %19 {strides = array<i32>} : memref<2x10xf32, #tpu.memory_space<vmem>>, vector<2x10xf32>,
    return
  }
  func.func @transform_0(%arg0: i32) -> (i32, i32) {
    %c0_i32 = arith.constant 0 : i32
    %c0_i32_0 = arith.constant 0 : i32
    %c0_i32_1 = arith.constant 0 : i32
    return %c0_i32, %c0_i32_0 : i32, i32
  }
  func.func @transform_1(%arg0: i32) -> (i32, i32) {
    %c0_i32 = arith.constant 0 : i32
    %c0_i32_0 = arith.constant 0 : i32
    %c0_i32_1 = arith.constant 0 : i32
    return %c0_i32, %c0_i32_0 : i32, i32
  }
  func.func @transform_2(%arg0: i32) -> (i32, i32) {
    %c0_i32 = arith.constant 0 : i32
    %c0_i32_0 = arith.constant 0 : i32
    %c0_i32_1 = arith.constant 0 : i32
    return %c0_i32, %c0_i32_0 : i32, i32
  }
  func.func @transform_3(%arg0: i32) -> (i32, i32) {
    %c0_i32 = arith.constant 0 : i32
    %c0_i32_0 = arith.constant 0 : i32
    %c0_i32_1 = arith.constant 0 : i32
    return %c0_i32, %c0_i32_0 : i32, i32
  }
  func.func @transform_4(%arg0: i32) -> (i32, i32) {
    %c0_i32 = arith.constant 0 : i32
    %c0_i32_0 = arith.constant 0 : i32
    %c0_i32_1 = arith.constant 0 : i32
    return %c0_i32, %c0_i32_0 : i32, i32
  }
  func.func @transform_5(%arg0: i32) -> (i32, i32) {
    %c0_i32 = arith.constant 0 : i32
    %c0_i32_0 = arith.constant 0 : i32
    %c0_i32_1 = arith.constant 0 : i32
    return %c0_i32, %c0_i32_0 : i32, i32
  }
  func.func @transform_6(%arg0: i32) -> (i32, i32) {
    %c0_i32 = arith.constant 0 : i32
    %c0_i32_0 = arith.constant 0 : i32
    %c0_i32_1 = arith.constant 0 : i32
    return %c0_i32, %c0_i32_0 : i32, i32
  }
  func.func @transform_7(%arg0: i32) -> (i32, i32) {
    %c0_i32 = arith.constant 0 : i32
    %c0_i32_0 = arith.constant 0 : i32
    %c0_i32_1 = arith.constant 0 : i32
    return %c0_i32, %c0_i32_0 : i32, i32
  }
}

</mosaic_0001>

<bundles_post_ra>
// kernel: net_forward.3
= control target key start
LH: loop header
LB: loop body
LE: loop exit
PB: predicated region body
PF: predicated region fallthrough
CT: control target
= control target key end

     0   :  { %v747_v3 = vmov 0.0   ;;  %vm31_vm0 = vcmask 261120   ;;  %s1005_s0 = inlined_call_operand.vmem [shape: f32[4,32,512], index: 0, kind: input, shape index: {}]   ;;  %s1006_s1 = inlined_call_operand.vmem [shape: f32[8,32], index: 1, kind: input, shape index: {}]   ;;  %s1007_s2 = inlined_call_operand.vmem [shape: f32[8,1], index: 2, kind: input, shape index: {}]   ;;  %s1008_s3 = inlined_call_operand.vmem [shape: f32[8,512], index: 3, kind: output, shape index: {}]  }
   0x1   :  { %v28_v0 = vld [vmem:[%s1005_s0 + $0x68] sm:$0xff]  ;;  %v30_v1 = vld [vmem:[%s1005_s0 + $0x78] sm:$0xff]  ;;  %v27_v2 = vld [vmem:[%s1005_s0 + $0x60] sm:$0xff]  ;;  %99 = vmatprep.mubr.f32.mxu0 %v747_v3  ;;  %170 = vmatprep.mubr.f32.mxu1 %v747_v3 }
   0x2   :  { %59 = vmatprep.subr.mxu0 %v28_v0  ;;  %130 = vmatprep.subr.mxu1 %v30_v1  ;;  %v29_v4 = vld [vmem:[%s1005_s0 + $0x70] sm:$0xff]  ;;  %v24_v5 = vld [vmem:[%s1005_s0 + $0x48] sm:$0xff]  ;;  %v26_v6 = vld [vmem:[%s1005_s0 + $0x58] sm:$0xff] }
   0x3   :  { %60 = vmatpush1.msra.mxu0 %v27_v2  ;;  %131 = vmatpush1.msra.mxu1 %v29_v4  ;;  %v23_v7 = vld [vmem:[%s1005_s0 + $0x40] sm:$0xff]  ;;  %v25_v8 = vld [vmem:[%s1005_s0 + $0x50] sm:$0xff]  ;;  %v20_v9 = vld [vmem:[%s1005_s0 + $0x28] sm:$0xff]  ;;  %v748_v4 = vmov 0  }
   0x4   :  { %61 = vmatprep.subr.mxu0 %v24_v5  ;;  %132 = vmatprep.subr.mxu1 %v26_v6  ;;  %v22_v10 = vld [vmem:[%s1005_s0 + $0x38] sm:$0xff]  ;;  %v19_v11 = vld [vmem:[%s1005_s0 + $0x20] sm:$0xff]  ;;  %v21_v12 = vld [vmem:[%s1005_s0 + $0x30] sm:$0xff] }
   0x5   :  { %62 = vmatpush1.msra.mxu0 %v23_v7  ;;  %133 = vmatpush1.msra.mxu1 %v25_v8  ;;  %v16_v13 = vld [vmem:[%s1005_s0 + $0x8] sm:$0xff]  ;;  %v18_v14 = vld [vmem:[%s1005_s0 + $0x18] sm:$0xff]  ;;  %v15_v15 = vld [vmem:[%s1005_s0] sm:$0xff] }
   0x6   :  { %63 = vmatprep.subr.mxu0 %v20_v9  ;;  %134 = vmatprep.subr.mxu1 %v22_v10  ;;  %v17_v16 = vld [vmem:[%s1005_s0 + $0x10] sm:$0xff]  ;;  %v822_v17 = vld [vmem:[%s1006_s1] sm:$0xff]  ;;  %v703_v18 = vld [vmem:[%s1005_s0 + $0xe8] sm:$0xff] }
   0x7   :  { %64 = vmatpush1.msra.mxu0 %v19_v11  ;;  %135 = vmatpush1.msra.mxu1 %v21_v12  ;;  %v705_v19 = vld [vmem:[%s1005_s0 + $0xf8] sm:$0xff]  ;;  %v702_v20 = vld [vmem:[%s1005_s0 + $0xe0] sm:$0xff]  ;;  %v704_v21 = vld [vmem:[%s1005_s0 + $0xf0] sm:$0xff] }
   0x8   :  { %65 = vmatprep.subr.mxu0 %v16_v13  ;;  %136 = vmatprep.subr.mxu1 %v18_v14  ;;  %v699_v22 = vld [vmem:[%s1005_s0 + $0xc8] sm:$0xff]  ;;  %v701_v23 = vld [vmem:[%s1005_s0 + $0xd8] sm:$0xff]  ;;  %v698_v24 = vld [vmem:[%s1005_s0 + $0xc0] sm:$0xff] }
   0x9   :  { %66 = vmatpush1.msra.mxu0 %v15_v15  ;;  %137 = vmatpush1.msra.mxu1 %v17_v16  ;;  %v700_v25 = vld [vmem:[%s1005_s0 + $0xd0] sm:$0xff]  ;;  %v695_v26 = vld [vmem:[%s1005_s0 + $0xa8] sm:$0xff]  ;;  %v697_v27 = vld [vmem:[%s1005_s0 + $0xb8] sm:$0xff] }
   0xa   :  { %688 = vmatmul.mubr.msk.f32.vlgmr.msra.gmra.mxu0 %vm31_vm0, %v822_v17  ;;  %689 = vmatmul.mubr.msk.f32.vlgmr.msra.gmra.mxu1 %vm31_vm0, %v822_v17  ;;  %v694_v28 = vld [vmem:[%s1005_s0 + $0xa0] sm:$0xff]  ;;  %v696_v29 = vld [vmem:[%s1005_s0 + $0xb0] sm:$0xff]  ;;  %v691_v30 = vld [vmem:[%s1005_s0 + $0x88] sm:$0xff] }
   0xb   :  { %218 = vmatprep.subr.mxu0 %v703_v18  ;;  %289 = vmatprep.subr.mxu1 %v705_v19  ;;  %v693_v31 = vld [vmem:[%s1005_s0 + $0x98] sm:$0xff]  ;;  %v690_v32 = vld [vmem:[%s1005_s0 + $0x80] sm:$0xff]  ;;  %v692_v33 = vld [vmem:[%s1005_s0 + $0x90] sm:$0xff] }
   0xc   :  { %219 = vmatpush1.msra.mxu0 %v702_v20  ;;  %290 = vmatpush1.msra.mxu1 %v704_v21  ;;  %v721_v34 = vld [vmem:[%s1005_s0 + $0x168] sm:$0xff]  ;;  %v723_v35 = vld [vmem:[%s1005_s0 + $0x178] sm:$0xff]  ;;  %v720_v36 = vld [vmem:[%s1005_s0 + $0x160] sm:$0xff] }
   0xd   :  { %220 = vmatprep.subr.mxu0 %v699_v22  ;;  %291 = vmatprep.subr.mxu1 %v701_v23  ;;  %v722_v37 = vld [vmem:[%s1005_s0 + $0x170] sm:$0xff]  ;;  %v717_v38 = vld [vmem:[%s1005_s0 + $0x148] sm:$0xff]  ;;  %v719_v39 = vld [vmem:[%s1005_s0 + $0x158] sm:$0xff] }
   0xe   :  { %221 = vmatpush1.msra.mxu0 %v698_v24  ;;  %292 = vmatpush1.msra.mxu1 %v700_v25  ;;  %v716_v40 = vld [vmem:[%s1005_s0 + $0x140] sm:$0xff]  ;;  %v718_v41 = vld [vmem:[%s1005_s0 + $0x150] sm:$0xff]  ;;  %v713_v42 = vld [vmem:[%s1005_s0 + $0x128] sm:$0xff] }
   0xf   :  { %222 = vmatprep.subr.mxu0 %v695_v26  ;;  %293 = vmatprep.subr.mxu1 %v697_v27  ;;  %v715_v43 = vld [vmem:[%s1005_s0 + $0x138] sm:$0xff]  ;;  %v712_v44 = vld [vmem:[%s1005_s0 + $0x120] sm:$0xff]  ;;  %v714_v45 = vld [vmem:[%s1005_s0 + $0x130] sm:$0xff] }
  0x10   :  { %223 = vmatpush1.msra.mxu0 %v694_v28  ;;  %294 = vmatpush1.msra.mxu1 %v696_v29  ;;  %v709_v46 = vld [vmem:[%s1005_s0 + $0x108] sm:$0xff]  ;;  %v711_v47 = vld [vmem:[%s1005_s0 + $0x118] sm:$0xff]  ;;  %v708_v48 = vld [vmem:[%s1005_s0 + $0x100] sm:$0xff] }
  0x11   :  { %224 = vmatprep.subr.mxu0 %v691_v30  ;;  %295 = vmatprep.subr.mxu1 %v693_v31  ;;  %v710_v49 = vld [vmem:[%s1005_s0 + $0x110] sm:$0xff]  ;;  %v739_v50 = vld [vmem:[%s1005_s0 + $0x1e8] sm:$0xff]  ;;  %v741_v51 = vld [vmem:[%s1005_s0 + $0x1f8] sm:$0xff] }
  0x12   :  { %225 = vmatpush1.msra.mxu0 %v690_v32  ;;  %258 = vmatprep.mubr.f32.mxu0 %v747_v3  ;;  %v738_v52 = vld [vmem:[%s1005_s0 + $0x1e0] sm:$0xff]  ;;  %v740_v53 = vld [vmem:[%s1005_s0 + $0x1f0] sm:$0xff]  ;;  %v735_v54 = vld [vmem:[%s1005_s0 + $0x1c8] sm:$0xff] }
  0x13   :  { %296 = vmatpush1.msra.mxu1 %v692_v33  ;;  %329 = vmatprep.mubr.f32.mxu1 %v747_v3  ;;  %v737_v55 = vld [vmem:[%s1005_s0 + $0x1d8] sm:$0xff]  ;;  %v734_v56 = vld [vmem:[%s1005_s0 + $0x1c0] sm:$0xff]  ;;  %v736_v57 = vld [vmem:[%s1005_s0 + $0x1d0] sm:$0xff] }
  0x14   :  { %706 = vmatmul.mubr.msk.f32.vlgmr.msra.gmra.mxu0 %vm31_vm0, %v822_v17  ;;  %707 = vmatmul.mubr.msk.f32.vlgmr.msra.gmra.mxu1 %vm31_vm0, %v822_v17  ;;  %v731_v58 = vld [vmem:[%s1005_s0 + $0x1a8] sm:$0xff]  ;;  %v733_v59 = vld [vmem:[%s1005_s0 + $0x1b8] sm:$0xff]  ;;  %v730_v60 = vld [vmem:[%s1005_s0 + $0x1a0] sm:$0xff] }
  0x15   :  { %381 = vmatprep.subr.mxu0 %v721_v34  ;;  %452 = vmatprep.subr.mxu1 %v723_v35  ;;  %v732_v61 = vld [vmem:[%s1005_s0 + $0x1b0] sm:$0xff]  ;;  %v727_v62 = vld [vmem:[%s1005_s0 + $0x188] sm:$0xff]  ;;  %v729_v63 = vld [vmem:[%s1005_s0 + $0x198] sm:$0xff] }
  0x16   :  { %382 = vmatpush1.msra.mxu0 %v720_v36  ;;  %453 = vmatpush1.msra.mxu1 %v722_v37  ;;  %v726_v0 = vld [vmem:[%s1005_s0 + $0x180] sm:$0xff]  ;;  %v728_v1 = vld [vmem:[%s1005_s0 + $0x190] sm:$0xff] }
  0x17   :  { %383 = vmatprep.subr.mxu0 %v717_v38  ;;  %454 = vmatprep.subr.mxu1 %v719_v39  ;;  %v666_v2 = vld [vmem:[%s1007_s2] sm:$0xff] }
  0x18   :  { %384 = vmatpush1.msra.mxu0 %v716_v40  ;;  %455 = vmatpush1.msra.mxu1 %v718_v41 }
  0x19   :  { %385 = vmatprep.subr.mxu0 %v713_v42  ;;  %456 = vmatprep.subr.mxu1 %v715_v43 }
  0x1a   :  { %386 = vmatpush1.msra.mxu0 %v712_v44  ;;  %457 = vmatpush1.msra.mxu1 %v714_v45 }
  0x1b   :  { %387 = vmatprep.subr.mxu0 %v709_v46  ;;  %458 = vmatprep.subr.mxu1 %v711_v47 }
  0x1c   :  { %388 = vmatpush1.msra.mxu0 %v708_v48  ;;  %421 = vmatprep.mubr.f32.mxu0 %v747_v3 }
  0x1d   :  { %459 = vmatpush1.msra.mxu1 %v710_v49  ;;  %492 = vmatprep.mubr.f32.mxu1 %v747_v3 }
  0x1e   :  { %724 = vmatmul.mubr.msk.f32.vlgmr.msra.gmra.mxu0 %vm31_vm0, %v822_v17  ;;  %725 = vmatmul.mubr.msk.f32.vlgmr.msra.gmra.mxu1 %vm31_vm0, %v822_v17 }
  0x1f   :  { %544 = vmatprep.subr.mxu0 %v739_v50  ;;  %615 = vmatprep.subr.mxu1 %v741_v51 }
  0x20   :  { %545 = vmatpush1.msra.mxu0 %v738_v52  ;;  %616 = vmatpush1.msra.mxu1 %v740_v53 }
  0x21   :  { %546 = vmatprep.subr.mxu0 %v735_v54  ;;  %617 = vmatprep.subr.mxu1 %v737_v55 }
  0x22   :  { %547 = vmatpush1.msra.mxu0 %v734_v56  ;;  %618 = vmatpush1.msra.mxu1 %v736_v57 }
  0x23   :  { %548 = vmatprep.subr.mxu0 %v731_v58  ;;  %619 = vmatprep.subr.mxu1 %v733_v59 }
  0x24   :  { %549 = vmatpush1.msra.mxu0 %v730_v60  ;;  %620 = vmatpush1.msra.mxu1 %v732_v61 }
  0x25   :  { %550 = vmatprep.subr.mxu0 %v727_v62  ;;  %621 = vmatprep.subr.mxu1 %v729_v63 }
  0x26   :  { %551 = vmatpush1.msra.mxu0 %v726_v0  ;;  %584 = vmatprep.mubr.f32.mxu0 %v747_v3 }
  0x27   :  { %622 = vmatpush1.msra.mxu1 %v728_v1  ;;  %655 = vmatprep.mubr.f32.mxu1 %v747_v3 }
  0x28   :  { %742 = vmatmul.mubr.msk.f32.vlgmr.msra.gmra.mxu0 %vm31_vm0, %v822_v17  ;;  %743 = vmatmul.mubr.msk.f32.vlgmr.msra.gmra.mxu1 %vm31_vm0, %v822_v17 }
  0x29   :  { %746 = vset.pattern.permute.xlu0 %v748_v4 }
  0x2a   :  { %669 = vperm.xlu0 %746, %v666_v2  }
  0xa5   :  { %v670_v22 = vpop.permute.xlu0 %669 }
  0xca   :  { %v101_v5 = vpop.f32.mrf.mxu0  ;;  %v172_v6 = vpop.f32.mrf.mxu1 }
  0xcc   :  { %v103_v7 = vpop.f32.mrf.mxu0  ;;  %v174_v8 = vpop.f32.mrf.mxu1 }
  0xd4   :  { %v260_v9 = vpop.f32.mrf.mxu0  ;;  %v331_v10 = vpop.f32.mrf.mxu1 }
  0xd5   :  { %v336_v14 = vmax.f32 %v101_v5, %v260_v9  ;;  %v338_v15 = vmax.f32 %v172_v6, %v331_v10 }
  0xd6   :  { %v262_v3 = vpop.f32.mrf.mxu0  ;;  %v333_v11 = vpop.f32.mrf.mxu1 }
  0xd7   :  { %v337_v19 = vmax.f32 %v103_v7, %v262_v3  ;;  %v339_v20 = vmax.f32 %v174_v8, %v333_v11 }
  0xde   :  { %v423_v12 = vpop.f32.mrf.mxu0  ;;  %v494_v13 = vpop.f32.mrf.mxu1 }
  0xdf   :  { %v499_v17 = vmax.f32 %v336_v14, %v423_v12  ;;  %v501_v21 = vmax.f32 %v338_v15, %v494_v13 }
  0xe0   :  { %v425_v16 = vpop.f32.mrf.mxu0  ;;  %v496_v18 = vpop.f32.mrf.mxu1 }
  0xe1   :  { %v500_v25 = vmax.f32 %v337_v19, %v425_v16  ;;  %v502_v26 = vmax.f32 %v339_v20, %v496_v18 }
  0xe8   :  { %v586_v23 = vpop.f32.mrf.mxu0  ;;  %v657_v24 = vpop.f32.mrf.mxu1 }
  0xe9   :  { %v662_v27 = vmax.f32 %v499_v17, %v586_v23  ;;  %v664_v28 = vmax.f32 %v501_v21, %v657_v24 }
  0xea   :  { %v588_v29 = vpop.f32.mrf.mxu0  ;;  %v659_v30 = vpop.f32.mrf.mxu1 }
  0xeb   :  { %v672_v31 = vadd.f32 %v670_v22, %v662_v27  ;;  %v674_v32 = vadd.f32 %v670_v22, %v664_v28  ;;  %v663_v33 = vmax.f32 %v500_v25, %v588_v29  ;;  %v665_v34 = vmax.f32 %v502_v26, %v659_v30 }
  0xed   :  { %v676_v35 = vmax.f32 %v672_v31, 0.0  ;;  %v678_v36 = vmax.f32 %v674_v32, 0.0  ;;  %v673_v37 = vadd.f32 %v670_v22, %v663_v33  ;;  %v675_v38 = vadd.f32 %v670_v22, %v665_v34 }
  0xef   :  { %680 = vst [vmem:[%s1008_s3] sm:$0xff] %v676_v35  ;;  %682 = vst [vmem:[%s1008_s3 + $0x10] sm:$0xff] %v678_v36  ;;  %v677_v39 = vmax.f32 %v673_v37, 0.0  ;;  %v679_v40 = vmax.f32 %v675_v38, 0.0 }
  0xf1   :  { %681 = vst [vmem:[%s1008_s3 + $0x8] sm:$0xff] %v677_v39  ;;  %683 = vst [vmem:[%s1008_s3 + $0x18] sm:$0xff] %v679_v40 }

// kernel: net_forward.4
= control target key start
LH: loop header
LB: loop body
LE: loop exit
PB: predicated region body
PF: predicated region fallthrough
CT: control target
= control target key end

     0   :  { %v507_v0 = vmov 0.0   ;;  %vm38_vm0 = vcmask 261120   ;;  %s893_s0 = inlined_call_operand.vmem [shape: f32[4,160,128], index: 0, kind: input, shape index: {}]   ;;  %s894_s1 = inlined_call_operand.vmem [shape: f32[16,160], index: 1, kind: input, shape index: {}]   ;;  %s895_s2 = inlined_call_operand.vmem [shape: f32[16,1], index: 2, kind: input, shape index: {}]   ;;  %s896_s3 = inlined_call_operand.vmem [shape: f32[16,128], index: 3, kind: output, shape index: {}]  }
   0x1   :  { %45 = vmatprep.subr.mxu0 %v507_v0  ;;  %141 = vmatprep.subr.mxu1 %v507_v0  ;;  %v33_v1 = vld [vmem:[%s893_s0 + $0x78] sm:$0xff]  ;;  %v32_v3 = vld [vmem:[%s893_s0 + $0x70] sm:$0xff]  ;;  %v31_v5 = vld [vmem:[%s893_s0 + $0x68] sm:$0xff] }
   0x2   :  { %v453_v2 = vld [vmem:[%s893_s0 + $0x118] sm:$0xff]  ;;  %46 = vmatpush1.msra.mxu0 %v33_v1  ;;  %v452_v4 = vld [vmem:[%s893_s0 + $0x110] sm:$0xff]  ;;  %v451_v6 = vld [vmem:[%s893_s0 + $0x108] sm:$0xff] }
   0x3   :  { %142 = vmatpush1.msra.mxu1 %v453_v2  ;;  %47 = vmatprep.subr.mxu0 %v507_v0  ;;  %v30_v7 = vld [vmem:[%s893_s0 + $0x60] sm:$0xff]  ;;  %v29_v9 = vld [vmem:[%s893_s0 + $0x58] sm:$0xff]  ;;  %v28_v11 = vld [vmem:[%s893_s0 + $0x50] sm:$0xff] }
   0x4   :  { %143 = vmatprep.subr.mxu1 %v507_v0  ;;  %48 = vmatpush1.msra.mxu0 %v32_v3  ;;  %v450_v8 = vld [vmem:[%s893_s0 + $0x100] sm:$0xff]  ;;  %v449_v10 = vld [vmem:[%s893_s0 + $0xf8] sm:$0xff]  ;;  %v448_v12 = vld [vmem:[%s893_s0 + $0xf0] sm:$0xff] }
   0x5   :  { %144 = vmatpush1.msra.mxu1 %v452_v4  ;;  %49 = vmatprep.subr.mxu0 %v507_v0  ;;  %v27_v13 = vld [vmem:[%s893_s0 + $0x48] sm:$0xff]  ;;  %v26_v15 = vld [vmem:[%s893_s0 + $0x40] sm:$0xff]  ;;  %v25_v17 = vld [vmem:[%s893_s0 + $0x38] sm:$0xff] }
   0x6   :  { %145 = vmatprep.subr.mxu1 %v507_v0  ;;  %50 = vmatpush1.msra.mxu0 %v31_v5  ;;  %v447_v14 = vld [vmem:[%s893_s0 + $0xe8] sm:$0xff]  ;;  %v446_v16 = vld [vmem:[%s893_s0 + $0xe0] sm:$0xff]  ;;  %v445_v18 = vld [vmem:[%s893_s0 + $0xd8] sm:$0xff] }
   0x7   :  { %146 = vmatpush1.msra.mxu1 %v451_v6  ;;  %51 = vmatprep.subr.mxu0 %v507_v0  ;;  %v24_v19 = vld [vmem:[%s893_s0 + $0x30] sm:$0xff]  ;;  %v23_v21 = vld [vmem:[%s893_s0 + $0x28] sm:$0xff]  ;;  %v22_v23 = vld [vmem:[%s893_s0 + $0x20] sm:$0xff] }
   0x8   :  { %147 = vmatprep.subr.mxu1 %v507_v0  ;;  %52 = vmatpush1.msra.mxu0 %v30_v7  ;;  %v444_v20 = vld [vmem:[%s893_s0 + $0xd0] sm:$0xff]  ;;  %v443_v22 = vld [vmem:[%s893_s0 + $0xc8] sm:$0xff]  ;;  %v442_v24 = vld [vmem:[%s893_s0 + $0xc0] sm:$0xff] }
   0x9   :  { %148 = vmatpush1.msra.mxu1 %v450_v8  ;;  %53 = vmatprep.subr.mxu0 %v507_v0  ;;  %v21_v25 = vld [vmem:[%s893_s0 + $0x18] sm:$0xff]  ;;  %v20_v27 = vld [vmem:[%s893_s0 + $0x10] sm:$0xff]  ;;  %v19_v29 = vld [vmem:[%s893_s0 + $0x8] sm:$0xff] }
   0xa   :  { %149 = vmatprep.subr.mxu1 %v507_v0  ;;  %54 = vmatpush1.msra.mxu0 %v29_v9  ;;  %v441_v26 = vld [vmem:[%s893_s0 + $0xb8] sm:$0xff]  ;;  %v440_v28 = vld [vmem:[%s893_s0 + $0xb0] sm:$0xff]  ;;  %v439_v30 = vld [vmem:[%s893_s0 + $0xa8] sm:$0xff] }
   0xb   :  { %150 = vmatpush1.msra.mxu1 %v449_v10  ;;  %55 = vmatprep.subr.mxu0 %v507_v0  ;;  %v18_v31 = vld [vmem:[%s893_s0] sm:$0xff]  ;;  %v37_v33 = vld [vmem:[%s893_s0 + $0x98] sm:$0xff]  ;;  %v36_v35 = vld [vmem:[%s893_s0 + $0x90] sm:$0xff] }
   0xc   :  { %151 = vmatprep.subr.mxu1 %v507_v0  ;;  %56 = vmatpush1.msra.mxu0 %v28_v11  ;;  %v438_v32 = vld [vmem:[%s893_s0 + $0xa0] sm:$0xff]  ;;  %v457_v34 = vld [vmem:[%s893_s0 + $0x138] sm:$0xff]  ;;  %v456_v36 = vld [vmem:[%s893_s0 + $0x130] sm:$0xff] }
   0xd   :  { %152 = vmatpush1.msra.mxu1 %v448_v12  ;;  %57 = vmatprep.subr.mxu0 %v507_v0  ;;  %v35_v37 = vld [vmem:[%s893_s0 + $0x88] sm:$0xff]  ;;  %v34_v39 = vld [vmem:[%s893_s0 + $0x80] sm:$0xff]  ;;  %v475_v43 = vld [vmem:[%s893_s0 + $0x1b8] sm:$0xff] }
   0xe   :  { %153 = vmatprep.subr.mxu1 %v507_v0  ;;  %58 = vmatpush1.msra.mxu0 %v27_v13  ;;  %v455_v38 = vld [vmem:[%s893_s0 + $0x128] sm:$0xff]  ;;  %v454_v41 = vld [vmem:[%s893_s0 + $0x120] sm:$0xff]  ;;  %v497_v44 = vld [vmem:[%s893_s0 + $0x258] sm:$0xff] }
   0xf   :  { %154 = vmatpush1.msra.mxu1 %v447_v14  ;;  %59 = vmatprep.subr.mxu0 %v507_v0  ;;  %v687_v40 = vld [vmem:[%s894_s1 + $0x8] sm:$0xff]  ;;  %v695_v42 = vld [vmem:[%s894_s1] sm:$0xff]  ;;  %v474_v45 = vld [vmem:[%s893_s0 + $0x1b0] sm:$0xff] }
  0x10   :  { %155 = vmatprep.subr.mxu1 %v507_v0  ;;  %60 = vmatpush1.msra.mxu0 %v26_v15  ;;  %v496_v46 = vld [vmem:[%s893_s0 + $0x250] sm:$0xff]  ;;  %v473_v47 = vld [vmem:[%s893_s0 + $0x1a8] sm:$0xff]  ;;  %v472_v49 = vld [vmem:[%s893_s0 + $0x1a0] sm:$0xff] }
  0x11   :  { %156 = vmatpush1.msra.mxu1 %v446_v16  ;;  %61 = vmatprep.subr.mxu0 %v507_v0  ;;  %v495_v48 = vld [vmem:[%s893_s0 + $0x248] sm:$0xff]  ;;  %v494_v50 = vld [vmem:[%s893_s0 + $0x240] sm:$0xff]  ;;  %v471_v51 = vld [vmem:[%s893_s0 + $0x198] sm:$0xff] }
  0x12   :  { %157 = vmatprep.subr.mxu1 %v507_v0  ;;  %62 = vmatpush1.msra.mxu0 %v25_v17  ;;  %v493_v52 = vld [vmem:[%s893_s0 + $0x238] sm:$0xff]  ;;  %v470_v53 = vld [vmem:[%s893_s0 + $0x190] sm:$0xff]  ;;  %v469_v55 = vld [vmem:[%s893_s0 + $0x188] sm:$0xff] }
  0x13   :  { %158 = vmatpush1.msra.mxu1 %v445_v18  ;;  %63 = vmatprep.subr.mxu0 %v507_v0  ;;  %v492_v54 = vld [vmem:[%s893_s0 + $0x230] sm:$0xff]  ;;  %v491_v56 = vld [vmem:[%s893_s0 + $0x228] sm:$0xff]  ;;  %v468_v57 = vld [vmem:[%s893_s0 + $0x180] sm:$0xff] }
  0x14   :  { %159 = vmatprep.subr.mxu1 %v507_v0  ;;  %64 = vmatpush1.msra.mxu0 %v24_v19  ;;  %v490_v58 = vld [vmem:[%s893_s0 + $0x220] sm:$0xff]  ;;  %v467_v59 = vld [vmem:[%s893_s0 + $0x178] sm:$0xff]  ;;  %v466_v61 = vld [vmem:[%s893_s0 + $0x170] sm:$0xff] }
  0x15   :  { %160 = vmatpush1.msra.mxu1 %v444_v20  ;;  %65 = vmatprep.subr.mxu0 %v507_v0  ;;  %v489_v60 = vld [vmem:[%s893_s0 + $0x218] sm:$0xff]  ;;  %v488_v62 = vld [vmem:[%s893_s0 + $0x210] sm:$0xff]  ;;  %v465_v63 = vld [vmem:[%s893_s0 + $0x168] sm:$0xff] }
  0x16   :  { %161 = vmatprep.subr.mxu1 %v507_v0  ;;  %66 = vmatpush1.msra.mxu0 %v23_v21  ;;  %v487_v1 = vld [vmem:[%s893_s0 + $0x208] sm:$0xff]  ;;  %v464_v2 = vld [vmem:[%s893_s0 + $0x160] sm:$0xff]  ;;  %v463_v4 = vld [vmem:[%s893_s0 + $0x158] sm:$0xff] }
  0x17   :  { %162 = vmatpush1.msra.mxu1 %v443_v22  ;;  %67 = vmatprep.subr.mxu0 %v507_v0  ;;  %v486_v3 = vld [vmem:[%s893_s0 + $0x200] sm:$0xff]  ;;  %v485_v5 = vld [vmem:[%s893_s0 + $0x1f8] sm:$0xff]  ;;  %v462_v6 = vld [vmem:[%s893_s0 + $0x150] sm:$0xff] }
  0x18   :  { %163 = vmatprep.subr.mxu1 %v507_v0  ;;  %68 = vmatpush1.msra.mxu0 %v22_v23  ;;  %v484_v7 = vld [vmem:[%s893_s0 + $0x1f0] sm:$0xff]  ;;  %v461_v8 = vld [vmem:[%s893_s0 + $0x148] sm:$0xff]  ;;  %v460_v10 = vld [vmem:[%s893_s0 + $0x140] sm:$0xff] }
  0x19   :  { %164 = vmatpush1.msra.mxu1 %v442_v24  ;;  %69 = vmatprep.subr.mxu0 %v507_v0  ;;  %v483_v9 = vld [vmem:[%s893_s0 + $0x1e8] sm:$0xff]  ;;  %v482_v11 = vld [vmem:[%s893_s0 + $0x1e0] sm:$0xff]  ;;  %v17_v12 = vld [vmem:[%s894_s1 + $0x18] sm:$0xff] }
  0x1a   :  { %165 = vmatprep.subr.mxu1 %v507_v0  ;;  %70 = vmatpush1.msra.mxu0 %v21_v25  ;;  %v479_v13 = vld [vmem:[%s893_s0 + $0x1d8] sm:$0xff]  ;;  %v16_v15 = vld [vmem:[%s894_s1 + $0x10] sm:$0xff]  ;;  %v477_v18 = vld [vmem:[%s893_s0 + $0x1c8] sm:$0xff] }
  0x1b   :  { %166 = vmatpush1.msra.mxu1 %v441_v26  ;;  %71 = vmatprep.subr.mxu0 %v507_v0  ;;  %v501_v14 = vld [vmem:[%s893_s0 + $0x278] sm:$0xff]  ;;  %v478_v16 = vld [vmem:[%s893_s0 + $0x1d0] sm:$0xff]  ;;  %v499_v19 = vld [vmem:[%s893_s0 + $0x268] sm:$0xff] }
  0x1c   :  { %167 = vmatprep.subr.mxu1 %v507_v0  ;;  %72 = vmatpush1.msra.mxu0 %v20_v27  ;;  %v500_v17 = vld [vmem:[%s893_s0 + $0x270] sm:$0xff]  ;;  %v476_v20 = vld [vmem:[%s893_s0 + $0x1c0] sm:$0xff]  ;;  %v415_v23 = vld [vmem:[%s895_s2 + $0x8] sm:$0xff] }
  0x1d   :  { %168 = vmatpush1.msra.mxu1 %v440_v28  ;;  %73 = vmatprep.subr.mxu0 %v507_v0  ;;  %v498_v21 = vld [vmem:[%s893_s0 + $0x260] sm:$0xff] }
  0x1e   :  { %169 = vmatprep.subr.mxu1 %v507_v0  ;;  %74 = vmatpush1.msra.mxu0 %v19_v29  ;;  %v414_v22 = vld [vmem:[%s895_s2] sm:$0xff] }
  0x1f   :  { %170 = vmatpush1.msra.mxu1 %v439_v30  ;;  %75 = vmatprep.subr.mxu0 %v507_v0 }
  0x20   :  { %171 = vmatprep.subr.mxu1 %v507_v0  ;;  %76 = vmatpush1.msra.mxu0 %v18_v31 }
  0x21   :  { %172 = vmatpush1.msra.mxu1 %v438_v32  ;;  %101 = vmatprep.subr.mxu0 %v507_v0 }
  0x22   :  { %197 = vmatprep.subr.mxu1 %v507_v0  ;;  %102 = vmatpush2.msra.mxu0 %v37_v33 }
  0x23   :  { %198 = vmatpush2.msra.mxu1 %v457_v34  ;;  %103 = vmatprep.subr.mxu0 %v507_v0 }
  0x24   :  { %199 = vmatprep.subr.mxu1 %v507_v0  ;;  %104 = vmatpush2.msra.mxu0 %v36_v35 }
  0x25   :  { %200 = vmatpush2.msra.mxu1 %v456_v36  ;;  %105 = vmatprep.subr.mxu0 %v507_v0 }
  0x26   :  { %201 = vmatprep.subr.mxu1 %v507_v0  ;;  %106 = vmatpush2.msra.mxu0 %v35_v37 }
  0x27   :  { %202 = vmatpush2.msra.mxu1 %v455_v38  ;;  %107 = vmatprep.subr.mxu0 %v507_v0 }
  0x28   :  { %203 = vmatprep.subr.mxu1 %v507_v0  ;;  %108 = vmatpush2.msra.mxu0 %v34_v39 }
  0x29   :  { %436 = vmatprep.mubr.msk.f32.mxu0 %vm38_vm0, %v687_v40  ;;  %204 = vmatpush2.msra.mxu1 %v454_v41 }
  0x2a   :  { %110 = vmatmul.mubr.f32.vlgmr.msra.gmra.mxu0 %v695_v42  ;;  %458 = vmatprep.mubr.msk.f32.mxu1 %vm38_vm0, %v687_v40 }
  0x2b   :  { %239 = vmatprep.subr.mxu0 %v507_v0  ;;  %337 = vmatprep.subr.mxu1 %v507_v0 }
  0x2c   :  { %206 = vmatmul.mubr.f32.vlgmr.msra.gmra.mxu1 %v695_v42  ;;  %240 = vmatpush1.msra.mxu0 %v475_v43 }
  0x2d   :  { %338 = vmatpush1.msra.mxu1 %v497_v44  ;;  %241 = vmatprep.subr.mxu0 %v507_v0 }
  0x2e   :  { %339 = vmatprep.subr.mxu1 %v507_v0  ;;  %242 = vmatpush1.msra.mxu0 %v474_v45 }
  0x2f   :  { %340 = vmatpush1.msra.mxu1 %v496_v46  ;;  %243 = vmatprep.subr.mxu0 %v507_v0 }
  0x30   :  { %341 = vmatprep.subr.mxu1 %v507_v0  ;;  %244 = vmatpush1.msra.mxu0 %v473_v47 }
  0x31   :  { %342 = vmatpush1.msra.mxu1 %v495_v48  ;;  %245 = vmatprep.subr.mxu0 %v507_v0 }
  0x32   :  { %343 = vmatprep.subr.mxu1 %v507_v0  ;;  %246 = vmatpush1.msra.mxu0 %v472_v49 }
  0x33   :  { %344 = vmatpush1.msra.mxu1 %v494_v50  ;;  %247 = vmatprep.subr.mxu0 %v507_v0 }
  0x34   :  { %345 = vmatprep.subr.mxu1 %v507_v0  ;;  %248 = vmatpush1.msra.mxu0 %v471_v51 }
  0x35   :  { %346 = vmatpush1.msra.mxu1 %v493_v52  ;;  %249 = vmatprep.subr.mxu0 %v507_v0 }
  0x36   :  { %347 = vmatprep.subr.mxu1 %v507_v0  ;;  %250 = vmatpush1.msra.mxu0 %v470_v53 }
  0x37   :  { %348 = vmatpush1.msra.mxu1 %v492_v54  ;;  %251 = vmatprep.subr.mxu0 %v507_v0 }
  0x38   :  { %349 = vmatprep.subr.mxu1 %v507_v0  ;;  %252 = vmatpush1.msra.mxu0 %v469_v55 }
  0x39   :  { %350 = vmatpush1.msra.mxu1 %v491_v56  ;;  %253 = vmatprep.subr.mxu0 %v507_v0 }
  0x3a   :  { %351 = vmatprep.subr.mxu1 %v507_v0  ;;  %254 = vmatpush1.msra.mxu0 %v468_v57 }
  0x3b   :  { %352 = vmatpush1.msra.mxu1 %v490_v58  ;;  %255 = vmatprep.subr.mxu0 %v507_v0 }
  0x3c   :  { %353 = vmatprep.subr.mxu1 %v507_v0  ;;  %256 = vmatpush1.msra.mxu0 %v467_v59 }
  0x3d   :  { %354 = vmatpush1.msra.mxu1 %v489_v60  ;;  %257 = vmatprep.subr.mxu0 %v507_v0 }
  0x3e   :  { %355 = vmatprep.subr.mxu1 %v507_v0  ;;  %258 = vmatpush1.msra.mxu0 %v466_v61 }
  0x3f   :  { %356 = vmatpush1.msra.mxu1 %v488_v62  ;;  %259 = vmatprep.subr.mxu0 %v507_v0 }
  0x40   :  { %357 = vmatprep.subr.mxu1 %v507_v0  ;;  %260 = vmatpush1.msra.mxu0 %v465_v63 }
  0x41   :  { %358 = vmatpush1.msra.mxu1 %v487_v1  ;;  %261 = vmatprep.subr.mxu0 %v507_v0 }
  0x42   :  { %359 = vmatprep.subr.mxu1 %v507_v0  ;;  %262 = vmatpush1.msra.mxu0 %v464_v2 }
  0x43   :  { %360 = vmatpush1.msra.mxu1 %v486_v3  ;;  %263 = vmatprep.subr.mxu0 %v507_v0 }
  0x44   :  { %361 = vmatprep.subr.mxu1 %v507_v0  ;;  %264 = vmatpush1.msra.mxu0 %v463_v4 }
  0x45   :  { %362 = vmatpush1.msra.mxu1 %v485_v5  ;;  %265 = vmatprep.subr.mxu0 %v507_v0 }
  0x46   :  { %363 = vmatprep.subr.mxu1 %v507_v0  ;;  %266 = vmatpush1.msra.mxu0 %v462_v6 }
  0x47   :  { %364 = vmatpush1.msra.mxu1 %v484_v7  ;;  %267 = vmatprep.subr.mxu0 %v507_v0 }
  0x48   :  { %365 = vmatprep.subr.mxu1 %v507_v0  ;;  %268 = vmatpush1.msra.mxu0 %v461_v8 }
  0x49   :  { %366 = vmatpush1.msra.mxu1 %v483_v9  ;;  %269 = vmatprep.subr.mxu0 %v507_v0 }
  0x4a   :  { %367 = vmatprep.subr.mxu1 %v507_v0  ;;  %270 = vmatpush1.msra.mxu0 %v460_v10 }
  0x4b   :  { %368 = vmatpush1.msra.mxu1 %v482_v11  ;;  %295 = vmatprep.subr.mxu0 %v507_v0 }
  0x4c   :  { %393 = vmatprep.subr.mxu1 %v507_v0  ;;  %437 = vmatprep.mubr.msk.f32.mxu0 %vm38_vm0, %v17_v12 }
  0x4d   :  { %296 = vmatpush2.msra.mxu0 %v479_v13  ;;  %394 = vmatpush2.msra.mxu1 %v501_v14 }
  0x4e   :  { %115 = vmatmul.mubr.f32.gmra.mxu0 %v16_v15  ;;  %297 = vmatprep.subr.mxu0 %v507_v0 }
  0x4f   :  { %395 = vmatprep.subr.mxu1 %v507_v0  ;;  %459 = vmatprep.mubr.msk.f32.mxu1 %vm38_vm0, %v17_v12 }
  0x50   :  { %298 = vmatpush2.msra.mxu0 %v478_v16  ;;  %396 = vmatpush2.msra.mxu1 %v500_v17 }
  0x51   :  { %299 = vmatprep.subr.mxu0 %v507_v0  ;;  %211 = vmatmul.mubr.f32.gmra.mxu1 %v16_v15 }
  0x52   :  { %397 = vmatprep.subr.mxu1 %v507_v0  ;;  %300 = vmatpush2.msra.mxu0 %v477_v18 }
  0x53   :  { %398 = vmatpush2.msra.mxu1 %v499_v19  ;;  %301 = vmatprep.subr.mxu0 %v507_v0 }
  0x54   :  { %399 = vmatprep.subr.mxu1 %v507_v0  ;;  %302 = vmatpush2.msra.mxu0 %v476_v20  ;;  %v508_v0 = vmov 0  }
  0x55   :  { %480 = vmatprep.mubr.msk.f32.mxu0 %vm38_vm0, %v687_v40  ;;  %400 = vmatpush2.msra.mxu1 %v498_v21 }
  0x56   :  { %502 = vmatprep.mubr.msk.f32.mxu1 %vm38_vm0, %v687_v40  ;;  %304 = vmatmul.mubr.f32.vlgmr.msra.gmra.mxu0 %v695_v42 }
  0x57   :  { %402 = vmatmul.mubr.f32.vlgmr.msra.gmra.mxu1 %v695_v42  ;;  %481 = vmatprep.mubr.msk.f32.mxu0 %vm38_vm0, %v17_v12 }
  0x58   :  { %503 = vmatprep.mubr.msk.f32.mxu1 %vm38_vm0, %v17_v12  ;;  %506 = vset.pattern.permute.xlu0 %v508_v0 }
  0x59   :  { %418 = vperm.xlu0 %506, %v414_v22  }
  0x5a   :  { %309 = vmatmul.mubr.f32.gmra.mxu0 %v16_v15 }
  0x5b   :  { %407 = vmatmul.mubr.f32.gmra.mxu1 %v16_v15 }
  0x5d   :  { %423 = vperm.xlu0 %506, %v415_v23  }
  0xd4   :  { %v419_v35 = vpop.permute.xlu0 %418 }
  0xd8   :  { %v424_v49 = vpop.permute.xlu0 %423 }
  0xea   :  { %v111_v24 = vpop.f32.mrf.mxu0 }
  0xec   :  { %v207_v25 = vpop.f32.mrf.mxu1  ;;  %v113_v26 = vpop.f32.mrf.mxu0 }
  0xed   :  { %v216_v32 = vmax.f32 %v111_v24, %v207_v25 }
  0xee   :  { %v209_v27 = vpop.f32.mrf.mxu1 }
 0x10e   :  { %v116_v28 = vpop.f32.mrf.mxu0 }
 0x110   :  { %v118_v29 = vpop.f32.mrf.mxu0 }
 0x111   :  { %v212_v30 = vpop.f32.mrf.mxu1 }
 0x112   :  { %v217_v39 = vmax.f32 %v116_v28, %v212_v30 }
 0x113   :  { %v214_v31 = vpop.f32.mrf.mxu1 }
 0x116   :  { %v305_v33 = vpop.f32.mrf.mxu0 }
 0x117   :  { %v403_v34 = vpop.f32.mrf.mxu1  ;;  %v314_v36 = vmax.f32 %v216_v32, %v305_v33 }
 0x118   :  { %v307_v37 = vpop.f32.mrf.mxu0 }
 0x119   :  { %v405_v38 = vpop.f32.mrf.mxu1  ;;  %v412_v40 = vmax.f32 %v314_v36, %v403_v34 }
 0x11a   :  { %v310_v41 = vpop.f32.mrf.mxu0 }
 0x11b   :  { %v408_v42 = vpop.f32.mrf.mxu1  ;;  %v426_v43 = vadd.f32 %v419_v35, %v412_v40  ;;  %v315_v44 = vmax.f32 %v217_v39, %v310_v41 }
 0x11c   :  { %v312_v45 = vpop.f32.mrf.mxu0 }
 0x11d   :  { %v410_v46 = vpop.f32.mrf.mxu1  ;;  %v428_v47 = vmax.f32 %v426_v43, 0.0  ;;  %v413_v48 = vmax.f32 %v315_v44, %v408_v42 }
 0x11f   :  { %430 = vst [vmem:[%s896_s3] sm:$0xff] %v428_v47  ;;  %v427_v50 = vadd.f32 %v424_v49, %v413_v48 }
 0x121   :  { %v429_v51 = vmax.f32 %v427_v50, 0.0 }
 0x123   :  { %431 = vst [vmem:[%s896_s3 + $0x8] sm:$0xff] %v429_v51 }

// kernel: net_forward.5
= control target key start
LH: loop header
LB: loop body
LE: loop exit
PB: predicated region body
PF: predicated region fallthrough
CT: control target
= control target key end

     0   :  { %v614_v3 = vmov 0.0   ;;  %v615_v23 = vmov 1983009808   ;;  %v90_v25 = vlaneseq  ;;  %s947_s0 = inlined_call_operand.vmem [shape: f32[2,400], index: 0, kind: input, shape index: {}]   ;;  %s948_s1 = inlined_call_operand.vmem [shape: f32[400,120], index: 1, kind: input, shape index: {}]   ;;  %s949_s2 = inlined_call_operand.vmem [shape: f32[1,120], index: 2, kind: input, shape index: {}]   ;;  %s950_s3 = inlined_call_operand.vmem [shape: f32[120,84], index: 3, kind: input, shape index: {}]   ;;  %s951_s4 = inlined_call_operand.vmem [shape: f32[1,84], index: 4, kind: input, shape index: {}]   ;;  %s952_s5 = inlined_call_operand.vmem [shape: f32[84,10], index: 5, kind: input, shape index: {}]   ;;  %s953_s6 = inlined_call_operand.vmem [shape: f32[1,10], index: 6, kind: input, shape index: {}]   ;;  %s954_s7 = inlined_call_operand.hbm [shape: f32[2,10], index: 7, kind: output, shape index: {}]  }
   0x1   :  { %v59_v0 = vld [vmem:[%s948_s1 + $0xf8] sm:$0xff]  ;;  %179 = vmatprep.subr.mxu1 %v614_v3  ;;  %v58_v4 = vld [vmem:[%s948_s1 + $0xf0] sm:$0xff]  ;;  %v57_v7 = vld [vmem:[%s948_s1 + $0xe8] sm:$0xff]  ;;  %v88_v24 = vunpack.c.l.s4 %v615_v23 }
   0x2   :  { %v43_v1 = vld [vmem:[%s948_s1 + $0x78] sm:$0xff]  ;;  %466 = vmatprep.subr.mxu0 %v59_v0  ;;  %v42_v5 = vld [vmem:[%s948_s1 + $0x70] sm:$0xff]  ;;  %v41_v8 = vld [vmem:[%s948_s1 + $0x68] sm:$0xff]  ;;  %v91_v33 = vshrl.u32 %v90_v25, 7 }
   0x3   :  { %v75_v2 = vld [vmem:[%s948_s1 + $0x178] sm:$0xff]  ;;  %v74_v6 = vld [vmem:[%s948_s1 + $0x170] sm:$0xff]  ;;  %467 = vmatpush3.msra.mxu0 %v43_v1  ;;  %v73_v9 = vld [vmem:[%s948_s1 + $0x168] sm:$0xff]  ;;  %v89_v32 = vunpack.c.0.s8 %v88_v24 }
   0x4   :  { %180 = vmatpush1.msra.mxu1 %v75_v2  ;;  %468 = vmatprep.subr.mxu0 %v58_v4  ;;  %v56_v10 = vld [vmem:[%s948_s1 + $0xe0] sm:$0xff]  ;;  %v55_v13 = vld [vmem:[%s948_s1 + $0xd8] sm:$0xff]  ;;  %v54_v16 = vld [vmem:[%s948_s1 + $0xd0] sm:$0xff] }
   0x5   :  { %181 = vmatprep.subr.mxu1 %v614_v3  ;;  %469 = vmatpush3.msra.mxu0 %v42_v5  ;;  %v40_v11 = vld [vmem:[%s948_s1 + $0x60] sm:$0xff]  ;;  %v39_v14 = vld [vmem:[%s948_s1 + $0x58] sm:$0xff]  ;;  %v38_v17 = vld [vmem:[%s948_s1 + $0x50] sm:$0xff]  ;;  %v92_v40 = vsub.s32 %v89_v32, %v91_v33 }
   0x6   :  { %182 = vmatpush1.msra.mxu1 %v74_v6  ;;  %470 = vmatprep.subr.mxu0 %v57_v7  ;;  %v72_v12 = vld [vmem:[%s948_s1 + $0x160] sm:$0xff]  ;;  %v71_v15 = vld [vmem:[%s948_s1 + $0x158] sm:$0xff]  ;;  %v70_v18 = vld [vmem:[%s948_s1 + $0x150] sm:$0xff] }
   0x7   :  { %183 = vmatprep.subr.mxu1 %v614_v3  ;;  %471 = vmatpush3.msra.mxu0 %v41_v8  ;;  %v53_v19 = vld [vmem:[%s948_s1 + $0xc8] sm:$0xff]  ;;  %v52_v22 = vld [vmem:[%s948_s1 + $0xc0] sm:$0xff]  ;;  %v51_v28 = vld [vmem:[%s948_s1 + $0xb8] sm:$0xff] }
   0x8   :  { %184 = vmatpush1.msra.mxu1 %v73_v9  ;;  %472 = vmatprep.subr.mxu0 %v56_v10  ;;  %v37_v20 = vld [vmem:[%s948_s1 + $0x48] sm:$0xff]  ;;  %v36_v26 = vld [vmem:[%s948_s1 + $0x40] sm:$0xff]  ;;  %v35_v29 = vld [vmem:[%s948_s1 + $0x38] sm:$0xff] }
   0x9   :  { %185 = vmatprep.subr.mxu1 %v614_v3  ;;  %473 = vmatpush3.msra.mxu0 %v40_v11  ;;  %v69_v21 = vld [vmem:[%s948_s1 + $0x148] sm:$0xff]  ;;  %v68_v27 = vld [vmem:[%s948_s1 + $0x140] sm:$0xff]  ;;  %v67_v30 = vld [vmem:[%s948_s1 + $0x138] sm:$0xff] }
   0xa   :  { %186 = vmatpush1.msra.mxu1 %v72_v12  ;;  %474 = vmatprep.subr.mxu0 %v55_v13  ;;  %v50_v31 = vld [vmem:[%s948_s1 + $0xb0] sm:$0xff]  ;;  %v49_v36 = vld [vmem:[%s948_s1 + $0xa8] sm:$0xff]  ;;  %v48_v39 = vld [vmem:[%s948_s1 + $0xa0] sm:$0xff] }
   0xb   :  { %187 = vmatprep.subr.mxu1 %v614_v3  ;;  %475 = vmatpush3.msra.mxu0 %v39_v14  ;;  %v34_v34 = vld [vmem:[%s948_s1 + $0x30] sm:$0xff]  ;;  %v33_v37 = vld [vmem:[%s948_s1 + $0x28] sm:$0xff] }
   0xc   :  { %188 = vmatpush1.msra.mxu1 %v71_v15  ;;  %476 = vmatprep.subr.mxu0 %v54_v16  ;;  %v66_v35 = vld [vmem:[%s948_s1 + $0x130] sm:$0xff]  ;;  %v65_v38 = vld [vmem:[%s948_s1 + $0x128] sm:$0xff] }
   0xd   :  { %189 = vmatprep.subr.mxu1 %v614_v3  ;;  %477 = vmatpush3.msra.mxu0 %v38_v17 }
   0xe   :  { %190 = vmatpush1.msra.mxu1 %v70_v18  ;;  %478 = vmatprep.subr.mxu0 %v53_v19 }
   0xf   :  { %191 = vmatprep.subr.mxu1 %v614_v3  ;;  %479 = vmatpush3.msra.mxu0 %v37_v20 }
  0x10   :  { %192 = vmatpush1.msra.mxu1 %v69_v21  ;;  %480 = vmatprep.subr.mxu0 %v52_v22 }
  0x11   :  { %193 = vmatprep.subr.mxu1 %v614_v3  ;;  %481 = vmatpush3.msra.mxu0 %v36_v26 }
  0x12   :  { %194 = vmatpush1.msra.mxu1 %v68_v27  ;;  %482 = vmatprep.subr.mxu0 %v51_v28 }
  0x13   :  { %195 = vmatprep.subr.mxu1 %v614_v3  ;;  %483 = vmatpush3.msra.mxu0 %v35_v29 }
  0x14   :  { %196 = vmatpush1.msra.mxu1 %v67_v30  ;;  %484 = vmatprep.subr.mxu0 %v50_v31 }
  0x15   :  { %197 = vmatprep.subr.mxu1 %v614_v3  ;;  %485 = vmatpush3.msra.mxu0 %v34_v34 }
  0x16   :  { %198 = vmatpush1.msra.mxu1 %v66_v35 }
  0x17   :  { %12 = vsyncpa [#allocation3], 0  ;;  %486 = vmatprep.subr.mxu0 %v49_v36  ;;  %199 = vmatprep.subr.mxu1 %v614_v3  ;;  %v32_v41 = vld [vmem:[%s948_s1 + $0x20] sm:$0xff]  ;;  %v47_v44 = vld [vmem:[%s948_s1 + $0x98] sm:$0xff]  ;;  %vm106_vm0 = vcmask 130048   ;;  %vm616_vm1 = vmmov 0  }
  0x18   :  { %v64_v42 = vld [vmem:[%s948_s1 + $0x120] sm:$0xff]  ;;  %487 = vmatpush3.msra.mxu0 %v33_v37  ;;  %200 = vmatpush1.msra.mxu1 %v65_v38  ;;  %v31_v46 = vld [vmem:[%s948_s1 + $0x18] sm:$0xff]  ;;  %v46_v48 = vld [vmem:[%s948_s1 + $0x90] sm:$0xff]  ;;  %vm369_vm2 = vcmask 1043456   ;;  %vm272_vm3 = vcmask 982016   ;;  %vm365_vm4 = vcmask 687104  }
  0x19   :  { %v27_v43 = vld [vmem:[%s947_s0] sm:$0xff]  ;;  %488 = vmatprep.subr.mxu0 %v48_v39  ;;  %201 = vmatprep.subr.mxu1 %v614_v3  ;;  %v63_v47 = vld [vmem:[%s948_s1 + $0x118] sm:$0xff]  ;;  %v30_v50 = vld [vmem:[%s948_s1 + $0x10] sm:$0xff]  ;;  %vm443_vm5 = vcmask 74752  }
  0x1a   :  { %v86_v45 = vcombine.high %v27_v43, %v27_v43  ;;  %489 = vmatpush3.msra.mxu0 %v32_v41  ;;  %202 = vmatpush1.msra.mxu1 %v64_v42  ;;  %v93_v49 = vrot.slane %v27_v43, %v92_v40  ;;  %v62_v51 = vld [vmem:[%s948_s1 + $0x110] sm:$0xff]  ;;  %v45_v52 = vld [vmem:[%s948_s1 + $0x88] sm:$0xff]  ;;  %v44_v56 = vld [vmem:[%s948_s1 + $0x80] sm:$0xff] }
  0x1b   :  { %490 = vmatprep.subr.mxu0 %v47_v44  ;;  %203 = vmatprep.subr.mxu1 %v614_v3  ;;  %v29_v54 = vld [vmem:[%s948_s1 + $0x8] sm:$0xff]  ;;  %v28_v58 = vld [vmem:[%s948_s1] sm:$0xff]  ;;  %v264_v62 = vld [vmem:[%s950_s3 + $0x70] sm:$0xff] }
  0x1c   :  { %491 = vmatpush3.msra.mxu0 %v31_v46  ;;  %204 = vmatpush1.msra.mxu1 %v63_v47  ;;  %v100_v53 = vrot.slane %v86_v45, %v92_v40  ;;  %v61_v55 = vld [vmem:[%s948_s1 + $0x108] sm:$0xff]  ;;  %v101_v57 = vcombine.high %v93_v49, %v93_v49  ;;  %v60_v59 = vld [vmem:[%s948_s1 + $0x100] sm:$0xff]  ;;  %v261_v2 = vld [vmem:[%s950_s3 + $0x58] sm:$0xff] }
  0x1d   :  { %492 = vmatprep.subr.mxu0 %v46_v48  ;;  %205 = vmatprep.subr.mxu1 %v614_v3  ;;  %v77_v61 = vld [vmem:[%s948_s1 + $0x188] sm:$0xff]  ;;  %v76_v63 = vld [vmem:[%s948_s1 + $0x180] sm:$0xff]  ;;  %v260_v4 = vld [vmem:[%s950_s3 + $0x50] sm:$0xff]  ;;  %s617_s1 = smov [#allocation2]  }
  0x1e   :  { %493 = vmatpush3.msra.mxu0 %v30_v50  ;;  %206 = vmatpush1.msra.mxu1 %v62_v51  ;;  %v102_v60 = vcombine.high %v100_v53, %v100_v53  ;;  %v263_v0 = vld [vmem:[%s950_s3 + $0x68] sm:$0xff]  ;;  %v262_v1 = vld [vmem:[%s950_s3 + $0x60] sm:$0xff]  ;;  %v257_v7 = vld [vmem:[%s950_s3 + $0x38] sm:$0xff]  ;;  %s451_s15 = sshll.u32 %s617_s1, 4  ;;  %s452_s15 = int_to_ptr.vmem [resolvable:$true] %s451_s15 }
  0x1f   :  { %494 = vmatprep.subr.mxu0 %v45_v52  ;;  %207 = vmatprep.subr.mxu1 %v614_v3  ;;  %v259_v5 = vld [vmem:[%s950_s3 + $0x48] sm:$0xff]  ;;  %v258_v6 = vld [vmem:[%s950_s3 + $0x40] sm:$0xff]  ;;  %v256_v8 = vld [vmem:[%s950_s3 + $0x30] sm:$0xff]  ;;  %p597_p1 = scmp.lt.s32.totalorder %s452_s15, %s452_s15 }
  0x20   :  { %495 = vmatpush3.msra.mxu0 %v29_v54  ;;  %208 = vmatpush1.msra.mxu1 %v61_v55  ;;  %v255_v9 = vld [vmem:[%s950_s3 + $0x28] sm:$0xff]  ;;  %v254_v10 = vld [vmem:[%s950_s3 + $0x20] sm:$0xff]  ;;  %v253_v11 = vld [vmem:[%s950_s3 + $0x18] sm:$0xff] }
  0x21   :  { %496 = vmatprep.subr.mxu0 %v44_v56  ;;  %209 = vmatprep.subr.mxu1 %v614_v3  ;;  %v252_v12 = vld [vmem:[%s950_s3 + $0x10] sm:$0xff]  ;;  %v251_v13 = vld [vmem:[%s950_s3 + $0x8] sm:$0xff]  ;;  %v250_v14 = vld [vmem:[%s950_s3] sm:$0xff] }
  0x22   :  { %497 = vmatpush3.msra.mxu0 %v28_v58  ;;  %173 = vmatprep.mubr.f32.mxu0 %v101_v57  ;;  %v357_v15 = vld [vmem:[%s952_s5 + $0x50] sm:$0xf]  ;;  %v356_v16 = vld [vmem:[%s952_s5 + $0x48] sm:$0xff]  ;;  %v355_v17 = vld [vmem:[%s952_s5 + $0x40] sm:$0xff] }
  0x23   :  { %210 = vmatpush1.msra.mxu1 %v60_v59  ;;  %174 = vmatmul.mubr.f32.vlgmr.msra.gmra.mxu0 %v93_v49  ;;  %v354_v18 = vld [vmem:[%s952_s5 + $0x38] sm:$0xff]  ;;  %v353_v19 = vld [vmem:[%s952_s5 + $0x30] sm:$0xff]  ;;  %v352_v20 = vld [vmem:[%s952_s5 + $0x28] sm:$0xff] }
  0x24   :  { %239 = vmatprep.subr.mxu1 %v614_v3  ;;  %460 = vmatprep.mubr.msk.f32.mxu1 %vm106_vm0, %v102_v60  ;;  %v351_v21 = vld [vmem:[%s952_s5 + $0x20] sm:$0xff]  ;;  %v350_v22 = vld [vmem:[%s952_s5 + $0x18] sm:$0xff]  ;;  %v349_v32 = vld [vmem:[%s952_s5 + $0x10] sm:$0xff] }
  0x25   :  { %240 = vmatpush2.msra.mxu1 %v77_v61  ;;  %529 = vmatprep.subr.mxu0 %v614_v3  ;;  %v459_v25 = vld [vmem:[%s949_s2] ss:$0 sm:$0xff]  ;;  %v348_v33 = vld [vmem:[%s952_s5 + $0x8] sm:$0xff] }
  0x26   :  { %241 = vmatprep.subr.mxu1 %v614_v3  ;;  %530 = vmatpush3.msra.mxu0 %v264_v62  ;;  %v347_v34 = vld [vmem:[%s952_s5] sm:$0xff]  ;;  %s592_s5 = scalar_lea.vmem %s452_s15, 32 }
  0x27   :  { %242 = vmatpush2.msra.mxu1 %v76_v63  ;;  %531 = vmatprep.subr.mxu0 %v614_v3  ;;  %v461_v35 = vld [vmem:[%s951_s4] ss:$0 sm:$0xff]  ;;  %p593_p0 = scmp.ne.s32.totalorder %s452_s15, %s592_s5  ;;  %p598_p2 = scmp.lt.s32.totalorder %s592_s5, %s592_s5 }
  0x28   :  { %244 = vmatmul.mubr.f32.vlgmr.msra.gmra.mxu1 %v100_v53  ;;  %532 = vmatpush3.msra.mxu0 %v263_v0  ;;  %v463_v40 = vld [vmem:[%s953_s6] ss:$0 sm:$0xff] }
  0x29   :  { %533 = vmatprep.subr.mxu0 %v614_v3  ;;  %562 = vmatprep.subr.mxu1 %v614_v3  ;;  %p599_p3 = por %p598_p2, %p597_p1 }
  0x2a   :  { %534 = vmatpush3.msra.mxu0 %v262_v1  ;;  %559 = vmatprep.mubr.msk.f32.mxu0 %vm616_vm1, %v614_v3 }
  0x2b   :  { %535 = vmatprep.subr.mxu0 %v614_v3  ;;  %584 = vmatprep.mubr.msk.f32.mxu1 %vm616_vm1, %v614_v3  ;;  %p600_p4 = pnand %p599_p3, %p593_p0 }
  0x2c   :  { %536 = vmatpush3.msra.mxu0 %v261_v2  ;;  %563 = vmatpush3.msk.msra.mxu1 %vm369_vm2, %v357_v15 }
  0x2d   :  { %537 = vmatprep.subr.mxu0 %v614_v3  ;;  %564 = vmatprep.subr.mxu1 %v614_v3 }
  0x2e   :  { %538 = vmatpush3.msra.mxu0 %v260_v4  ;;  %565 = vmatpush3.msra.mxu1 %v356_v16 }
  0x2f   :  { %539 = vmatprep.subr.mxu0 %v614_v3  ;;  %566 = vmatprep.subr.mxu1 %v614_v3 }
  0x30   :  { %540 = vmatpush3.msra.mxu0 %v259_v5  ;;  %567 = vmatpush3.msra.mxu1 %v355_v17 }
  0x31   :  { %541 = vmatprep.subr.mxu0 %v614_v3  ;;  %568 = vmatprep.subr.mxu1 %v614_v3 }
  0x32   :  { %542 = vmatpush3.msra.mxu0 %v258_v6  ;;  %569 = vmatpush3.msra.mxu1 %v354_v18 }
  0x33   :  { %543 = vmatprep.subr.mxu0 %v614_v3  ;;  %570 = vmatprep.subr.mxu1 %v614_v3 }
  0x34   :  { %544 = vmatpush3.msra.mxu0 %v257_v7  ;;  %571 = vmatpush3.msra.mxu1 %v353_v19 }
  0x35   :  { %545 = vmatprep.subr.mxu0 %v614_v3  ;;  %572 = vmatprep.subr.mxu1 %v614_v3 }
  0x36   :  { %546 = vmatpush3.msra.mxu0 %v256_v8  ;;  %573 = vmatpush3.msra.mxu1 %v352_v20 }
  0x37   :  { %547 = vmatprep.subr.mxu0 %v614_v3  ;;  %574 = vmatprep.subr.mxu1 %v614_v3 }
  0x38   :  { %548 = vmatpush3.msra.mxu0 %v255_v9  ;;  %575 = vmatpush3.msra.mxu1 %v351_v21 }
  0x39   :  { %549 = vmatprep.subr.mxu0 %v614_v3  ;;  %576 = vmatprep.subr.mxu1 %v614_v3 }
  0x3a   :  { %550 = vmatpush3.msra.mxu0 %v254_v10  ;;  %577 = vmatpush3.msra.mxu1 %v350_v22 }
  0x3b   :  { %551 = vmatprep.subr.mxu0 %v614_v3  ;;  %578 = vmatprep.subr.mxu1 %v614_v3 }
  0x3c   :  { %552 = vmatpush3.msra.mxu0 %v253_v11  ;;  %579 = vmatpush3.msra.mxu1 %v349_v32 }
  0x3d   :  { %553 = vmatprep.subr.mxu0 %v614_v3  ;;  %580 = vmatprep.subr.mxu1 %v614_v3 }
  0x3e   :  { %554 = vmatpush3.msra.mxu0 %v252_v12  ;;  %581 = vmatpush3.msra.mxu1 %v348_v33 }
  0x3f   :  { %555 = vmatprep.subr.mxu0 %v614_v3  ;;  %582 = vmatprep.subr.mxu1 %v614_v3 }
  0x40   :  { %556 = vmatpush3.msra.mxu0 %v251_v13  ;;  %583 = vmatpush3.msra.mxu1 %v347_v34 }
  0x41   :  { %557 = vmatprep.subr.mxu0 %v614_v3 }
  0x42   :  { %558 = vmatpush3.msra.mxu0 %v250_v14 }
  0xe3   :  { %v498_v23 = vpop.f32.mrf.mxu0 }
  0xe5   :  { %v499_v24 = vpop.f32.mrf.mxu0 }
  0xe6   :  { %v500_v26 = vadd.f32 %v499_v24, %v498_v23 }
  0xe8   :  { %v176_v27 = vadd.f32 %v500_v26, %v459_v25  ;;  %v245_v28 = vpop.f32.mrf.mxu1 }
  0xea   :  { %v246_v29 = vadd.f32 %v245_v28, %v176_v27  ;;  %v247_v30 = vpop.f32.mrf.mxu1 }
  0xec   :  { %v249_v31 = vmax.f32 %v246_v29, 0.0 }
  0xee   :  { %560 = vmatmul.mubr.msk.f32.vlgmr.msra.gmra.mxu0 %vm272_vm3, %v249_v31 }
 0x1ae   :  { %v342_v36 = vpop.f32.mrf.mxu0 }
 0x1af   :  { %v343_v37 = vadd.f32 %v461_v35, %v342_v36 }
 0x1b0   :  { %v561_v38 = vpop.f32.mrf.mxu0 }
 0x1b1   :  { %v346_v39 = vmax.f32 %v343_v37, 0.0 }
 0x1b3   :  { %585 = vmatmul.mubr.msk.f32.vlgmr.msra.gmra.mxu1 %vm365_vm4, %v346_v39 }
 0x273   :  { %v439_v41 = vpop.f32.mrf.mxu1 }
 0x274   :  { %v440_v3 = vadd.f32 %v463_v40, %v439_v41 }
 0x275   :  { %v586_v42 = vpop.f32.mrf.mxu1 }
 0x276   :  { %444 = vst.msk [vmem:[#allocation2] sm:$0x3] %vm443_vm5, %v440_v3 }
 0x277   :  { %603 = shalt.err (!%p600_p4)
}
 0x278   :  { %454 = dma.vmem_to_hbm [thread:$0]  %s452_s15, 32, %s954_s7, [#allocation3]  }
 0x279   :  { %612 = dma.done.wait [#allocation3], 32  }
 0x27a   :  { %613 = vsyncadd [#allocation3], 4294967264 }
 0x27b   :  { %458 = vsyncpa [#allocation3], 1 }

</bundles_post_ra>
